<compile_context>
chip_gen: v7x
topology: tpu7x:2x2x1
jax: 0.10.0
libtpu: 0.0.40
codegen_flags: <defaults>
</compile_context>

<pallas_src>
import functools

import jax
import jax.numpy as jnp
from jax import lax
from jax.experimental import pallas as pl
from jax.experimental.pallas import tpu as pltpu


def _vmem_budgets():
    """Generation-aware scoped-VMEM ceiling + live-tile budget (bytes)."""
    cap = 64 * 1024 * 1024            # conservative default = v7x per-TC VMEM
    try:
        cap = int(pltpu.get_tpu_info().vmem_capacity_bytes)
    except Exception:                 # non-TPU backend / API drift: keep default
        pass
    limit = (cap // 8) * 7            # ~112 MiB on v5e/v6e, ~56 MiB on v7x
    budget = max(limit - (12 << 20), 16 << 20)   # headroom for Mosaic scratch
    return limit, budget


def _pick_tbn(bn, dk, k, dv, budget_bytes):
    """BN tile size: multiple of 128 (lane-dense stores), sized for VMEM budget."""
    # Bytes that scale with the tile: double-buffered x (f32) + qv (f32) blocks,
    # bf16 hi/lo copies of x, and the (K, TBN) score/argmax/one-hot temporaries
    # (budgeted as ~6 live 32-bit values per (k, row)).
    per_row = 2 * 4 * dk + 2 * 4 * dv + 2 * 2 * dk + 24 * k
    # Per-codebook resident blocks (keys bf16, values hi/lo bf16, ksq, cs,
    # keys_sum); x2 in case the Buffered(1) fallback double-buffers them.
    resident = 2 * (2 * k * dk + 4 * k * dv + 4 * k + 4 * k + 4 * k * dk)
    avail = max(budget_bytes - resident, 128 * per_row)
    tbn = (avail // per_row) // 128 * 128
    tbn = int(max(128, min(tbn, 2048)))
    bn_ceil = ((bn + 127) // 128) * 128
    return min(tbn, bn_ceil)


def _kvb_kernel(x_ref, keys_ref, vhi_ref, vlo_ref, ksqh_ref,
                qv_ref, cs_ref, ks_ref, *,
                bn_true, tbn, natural_qv, packed_argmax, idx_bits):
    """Per-(codebook, BN-tile) body.

    x_ref:    (1, TBN, DK) f32   input rows of this codebook / BN tile
    keys_ref: (1, K,  DK)  bf16  keys (score dtype), resident per codebook
    vhi_ref:  values hi half, bf16, (1,K,DV) if natural_qv else (1,DV,K)
    vlo_ref:  values lo half, bf16, same layout as vhi_ref
    ksqh_ref: (1, K, 1)    f32   0.5*||k||^2 (from the bf16-rounded keys)
    qv_ref:   (1,TBN,DV) or (1,DV,TBN) f32   gathered values (lane-dense store)
    cs_ref:   (1, K, 1)    f32   per-key counts      (accumulated over BN tiles)
    ks_ref:   (1, K, DK)   f32   onehot^T @ x         (accumulated over BN tiles)
    """
    t = pl.program_id(1)

    @pl.when(t == 0)
    def _init():
        cs_ref[...] = jnp.zeros_like(cs_ref)
        ks_ref[...] = jnp.zeros_like(ks_ref)

    x = x_ref[0]                           # (TBN, DK) f32
    keys = keys_ref[0]                     # (K, DK)   bf16
    ksqh = ksqh_ref[0]                     # (K, 1)    f32
    kk = keys.shape[0]

    # Shared bf16 cast of x: feeds the scoring matmul AND is the hi half of the
    # hi/lo split used for the keys_sum matmul.
    x_bf = x.astype(keys.dtype)
    x_lo = (x - x_bf.astype(jnp.float32)).astype(keys.dtype)

    # Scores in (K, TBN) layout.  The per-row ||x||^2 term and the global 2x
    # factor of -(||x||^2 - 2 x.k + ||k||^2) are argmax-invariant: score = x.k
    # - 0.5||k||^2, single bf16 MXU pass with f32 accumulation.
    # TODO(synk): bf16 scoring can flip the argmax on near-ties vs the fp32
    # PyTorch reference.
    cross_t = lax.dot_general(keys, x_bf, (((1,), (1,)), ((), ())),
                              preferred_element_type=jnp.float32)   # (K, TBN)
    score_t = cross_t - ksqh

    key_iota = lax.broadcasted_iota(jnp.int32, (kk, tbn), 0)
    if packed_argmax:
        # Single packed max reduction: monotone int32 score bits with
        # (mask - key_index) packed into the low idx_bits (lowest index wins
        # ties / near-ties within the truncated precision).
        mask = (1 << idx_bits) - 1
        bits = pltpu.bitcast(score_t, jnp.int32)
        mono = jnp.where(bits < 0, bits ^ jnp.int32(0x7FFFFFFF), bits)
        low = mask - lax.broadcasted_iota(jnp.int32, (kk, 1), 0)
        packed = (mono & jnp.int32(~mask)) | low
        pmax = jnp.max(packed, axis=0, keepdims=True)                # (1, TBN)
        ind = mask - (pmax & jnp.int32(mask))                        # (1, TBN)
    else:
        # Exact argmax, first index wins ties (temperature == 0).
        smax = jnp.max(score_t, axis=0, keepdims=True)
        ind = jnp.min(jnp.where(score_t == smax, key_iota, kk),
                      axis=0, keepdims=True)

    onehot_t = key_iota == ind                                       # (K, TBN)
    # Mask padded rows so the fused EMA statistics match the unpadded input.
    row_idx = t * tbn + lax.broadcasted_iota(jnp.int32, (1, tbn), 1)
    onehot_t = jnp.logical_and(onehot_t, row_idx < bn_true)
    onehot_bf = onehot_t.astype(keys.dtype)       # exact 0/1 in bf16

    vhi = vhi_ref[0]
    vlo = vlo_ref[0]
    if natural_qv:
        # values in natural (K, DV) layout; DV is a 128-multiple -> lane-dense.
        qv_ref[0] = (
            lax.dot_general(onehot_bf, vhi, (((0,), (0,)), ((), ())),
                            preferred_element_type=jnp.float32)
            + lax.dot_general(onehot_bf, vlo, (((0,), (0,)), ((), ())),
                              preferred_element_type=jnp.float32))   # (TBN, DV)
    else:
        # values transposed (DV, K); output (DV, TBN) is lane-dense in TBN.
        qv_ref[0] = (
            jnp.dot(vhi, onehot_bf, preferred_element_type=jnp.float32)
            + jnp.dot(vlo, onehot_bf, preferred_element_type=jnp.float32))

    # Fused EMA statistics: the one-hot never leaves VMEM.
    cs_ref[0] += jnp.sum(onehot_t.astype(jnp.float32), axis=1, keepdims=True)
    ks_ref[0] += (jnp.dot(onehot_bf, x_bf, preferred_element_type=jnp.float32)
                  + jnp.dot(onehot_bf, x_lo, preferred_element_type=jnp.float32))


def kvb_pallas(flatten, keys, values, *, tbn=None, score_dtype=jnp.bfloat16):
    """flatten: (C, BN, DK); keys: (C, K, DK); values: (C, K, DV).

    Returns (qv_raw, qv_transposed, cluster_size_batch (C, K), keys_sum (C, K, DK))
    where qv_raw is (C, bn_pad, DV) if not qv_transposed else (C, DV, bn_pad).
    """
    C, BN, DK = flatten.shape
    _, K, DV = values.shape
    natural_qv = (DV % 128 == 0)      # lane-dense natural layout when possible

    vmem_limit, tile_budget = _vmem_budgets()
    if tbn is None:
        tbn = _pick_tbn(BN, DK, K, DV, tile_budget)
    n_tiles = pl.cdiv(BN, tbn)
    bn_pad = n_tiles * tbn
    if bn_pad != BN:
        flatten = jnp.pad(flatten, ((0, 0), (0, bn_pad - BN), (0, 0)))

    keys_s = keys.astype(score_dtype)                 # bf16 feed to the MXU
    # 0.5*||k||^2 from the *rounded* keys so the score uses one precision of k.
    keys_f = keys_s.astype(jnp.float32)
    ksq_half = 0.5 * jnp.sum(keys_f * keys_f, axis=-1, keepdims=True)   # (C,K,1)

    # hi/lo bf16 split of the values: one-hot gather in 2 bf16 MXU passes
    # (same bytes resident as one f32 copy, ~2^-16 relative error).
    v_hi = values.astype(score_dtype)
    v_lo = (values - v_hi.astype(jnp.float32)).astype(score_dtype)
    if not natural_qv:
        v_hi = jnp.transpose(v_hi, (0, 2, 1))          # (C, DV, K)
        v_lo = jnp.transpose(v_lo, (0, 2, 1))

    idx_bits = max(int(K - 1).bit_length(), 1)
    packed_argmax = idx_bits <= 8     # keep >= 15 mantissa bits of the score

    kernel = functools.partial(_kvb_kernel, bn_true=BN, tbn=tbn,
                               natural_qv=natural_qv,
                               packed_argmax=packed_argmax, idx_bits=idx_bits)

    cost = pl.CostEstimate(
        flops=int(2 * C * bn_pad * K * (3 * DK + 2 * DV)),
        transcendentals=0,
        bytes_accessed=int(4 * C * bn_pad * DK + 2 * C * K * DK
                           + 4 * C * K * DV + 4 * C * K
                           + 4 * C * DV * bn_pad + 4 * C * K + 4 * C * K * DK),
    )

    def _call(single_buffer_resident):
        res_kw = ({'pipeline_mode': pl.Buffered(1)}
                  if single_buffer_resident else {})
        v_blk = (1, K, DV) if natural_qv else (1, DV, K)
        in_specs = [
            pl.BlockSpec((1, tbn, DK), lambda c, t: (c, t, 0)),            # x tile
            pl.BlockSpec((1, K, DK), lambda c, t: (c, 0, 0), **res_kw),    # keys
            pl.BlockSpec(v_blk, lambda c, t: (c, 0, 0), **res_kw),         # vals hi
            pl.BlockSpec(v_blk, lambda c, t: (c, 0, 0), **res_kw),         # vals lo
            pl.BlockSpec((1, K, 1), lambda c, t: (c, 0, 0), **res_kw),     # 0.5||k||^2
        ]
        if natural_qv:
            qv_spec = pl.BlockSpec((1, tbn, DV), lambda c, t: (c, t, 0))
            qv_shape = (C, bn_pad, DV)
        else:
            qv_spec = pl.BlockSpec((1, DV, tbn), lambda c, t: (c, 0, t))
            qv_shape = (C, DV, bn_pad)
        out_specs = [
            qv_spec,
            pl.BlockSpec((1, K, 1), lambda c, t: (c, 0, 0), **res_kw),     # counts
            pl.BlockSpec((1, K, DK), lambda c, t: (c, 0, 0), **res_kw),    # keys_sum
        ]
        out_shape = [
            jax.ShapeDtypeStruct(qv_shape, jnp.float32),
            jax.ShapeDtypeStruct((C, K, 1), jnp.float32),
            jax.ShapeDtypeStruct((C, K, DK), jnp.float32),
        ]
        return pl.pallas_call(
            kernel,
            grid_spec=pltpu.PrefetchScalarGridSpec(
                num_scalar_prefetch=0, grid=(C, n_tiles),
                in_specs=in_specs, out_specs=out_specs),
            out_shape=out_shape,
            compiler_params=pltpu.CompilerParams(
                # TODO(synk): on v7x consider pltpu.CORE_PARALLEL on the C axis
                # if profiling shows one TensorCore idle.
                dimension_semantics=("parallel", "arbitrary"),
                vmem_limit_bytes=vmem_limit,
            ),
            cost_estimate=cost,
        )(flatten, keys_s, v_hi, v_lo, ksq_half)

    try:
        # Resident blocks single-buffered: they change block index only once
        # per codebook, and single-buffering frees VMEM for a bigger BN tile.
        qv_raw, cs, keys_sum = _call(True)
    except Exception:
        # pipeline_mode=pl.Buffered(1) not accepted by this jax build; fall
        # back to default double-buffered resident blocks (VMEM cost only).
        qv_raw, cs, keys_sum = _call(False)

    return qv_raw, (not natural_qv), cs[:, :, 0], keys_sum


def _kvb_xla(flatten, keys, values):
    """Plain-XLA fallback for tiny shapes (per-grid-step overhead dominated)."""
    K = keys.shape[1]
    cross = jnp.einsum("cid,cjd->cij", flatten, keys)
    ksq = jnp.sum(keys * keys, axis=-1)
    dist = 2.0 * cross - ksq[:, None, :]
    iota = jnp.arange(K)
    mx = dist.max(-1, keepdims=True)
    ind = jnp.min(jnp.where(dist == mx, iota, K), axis=-1)
    onehot = jax.nn.one_hot(ind, K, dtype=jnp.float32)
    qv = jnp.einsum("cik,ckv->civ", onehot, values)
    cs = onehot.sum(1)
    keys_sum = jnp.einsum("cik,cid->ckd", onehot, flatten)
    return qv, cs, keys_sum


def init_state(key, num_codebooks, pairs_per_codebook, dim_keys, dim_values):
    """Deterministic parameter/buffer init mirroring __init__ (init_mode='random')."""
    k1, k2 = jax.random.split(key)
    keys = jax.random.normal(k1, (num_codebooks, pairs_per_codebook, dim_keys),
                             jnp.float32)
    values = jax.random.normal(k2, (num_codebooks, pairs_per_codebook, dim_values),
                               jnp.float32)
    return dict(
        keys=keys,
        keys_avg=keys,
        values=values,
        cluster_size=jnp.zeros((num_codebooks, pairs_per_codebook), jnp.float32),
        cluster_size_counter=jnp.zeros((num_codebooks, pairs_per_codebook),
                                       jnp.float32),
    )


def kvb_forward(x, labels, state, *, decay=0.95, eps=1e-5, update_keys=True,
                use_pallas=None, score_dtype=jnp.bfloat16):
    """Forward pass. Returns ((quantized_values,), new_state).

    x: (b, c, n, dim_keys) float.  labels unused for init_mode='random'
    (init_embed_ is a no-op because initted == 0).
    """
    del labels
    x = x.astype(jnp.float32)
    b, c, n, dk = x.shape
    # 'b c n k -> c (b n) k'
    flatten = jnp.transpose(x, (1, 0, 2, 3)).reshape(c, b * n, dk)

    K = state["keys"].shape[1]
    dv = state["values"].shape[2]
    bn = b * n

    if use_pallas is None:
        # Small K / DK underfill the 256x256 MXU and the ~0.35us/grid-step
        # overhead dominates -> fused XLA wins for tiny problems.
        use_pallas = (bn * K * dk >= (1 << 20)) and (bn >= 512)

    if use_pallas:
        qv_raw, qv_transposed, cs_batch, keys_sum = kvb_pallas(
            flatten, state["keys"], state["values"], score_dtype=score_dtype)
    else:
        qv_raw, cs_batch, keys_sum = _kvb_xla(flatten, state["keys"],
                                              state["values"])
        qv_transposed = False

    new_state = dict(state)
    if update_keys:
        # forward_topk == 1 when update_keys is True
        new_cs = state["cluster_size"] * decay + cs_batch * (1.0 - decay)
        new_keys_avg = state["keys_avg"] * decay + keys_sum * (1.0 - decay)
        denom = new_cs.sum(-1, keepdims=True)
        cs_smoothed = (new_cs + eps) / (denom + K * eps) * denom
        new_keys = new_keys_avg / cs_smoothed[:, :, None]
        new_state.update(cluster_size=new_cs, keys_avg=new_keys_avg,
                         keys=new_keys)
        # TODO(synk): expire_codes_ is a structural no-op here because
        # threshold_ema_dead_code == 0 in the reference module defaults.

    # Single wrapper-side rearrange: kernel layout -> (b, c, topk=1, n, dv).
    if qv_transposed:
        qv = qv_raw[:, :, :bn].reshape(c, dv, b, n)
        quantized_values = jnp.transpose(qv, (2, 0, 3, 1))[:, :, None]
    else:
        qv = qv_raw[:, :bn].reshape(c, b, n, dv)
        quantized_values = jnp.transpose(qv, (1, 0, 2, 3))[:, :, None]
    return (quantized_values,), new_state


if __name__ == "__main__":
    key = jax.random.PRNGKey(0)
    kx, kp = jax.random.split(key)

    # small shapes consistent with forward's (b, c, n, k) convention
    b, num_codebooks, n, dim_keys = 2, 4, 8, 32
    pairs_per_codebook, dim_values = 16, 8

    x = jax.random.normal(kx, (b, num_codebooks, n, dim_keys), jnp.float32)
    labels = jnp.zeros((b,), jnp.int32)  # unused in 'random' init mode

    state = init_state(kp, num_codebooks, pairs_per_codebook, dim_keys,
                       dim_values)

    # force the Pallas path (the size heuristic would otherwise pick XLA here)
    (quantized_values,), new_state = kvb_forward(x, labels, state,
                                                 use_pallas=True)
    jax.block_until_ready(quantized_values)
    jax.block_until_ready(new_state["keys"])

    assert quantized_values.shape == (b, num_codebooks, 1, n, dim_values)
    assert quantized_values.dtype == jnp.float32
    assert bool(jnp.all(jnp.isfinite(quantized_values)))
    assert new_state["keys"].shape == state["keys"].shape
    assert new_state["cluster_size"].shape == state["cluster_size"].shape

    # every output row must (approximately) equal one of its codebook's value rows
    q = jnp.transpose(quantized_values[:, :, 0], (1, 0, 2, 3)).reshape(
        num_codebooks, b * n, dim_values)
    nearest = jnp.min(
        jnp.max(jnp.abs(q[:, :, None, :] - state["values"][:, None, :, :]),
                axis=-1),
        axis=-1)
    assert bool(jnp.all(nearest < 5e-2))

    # cluster counts per codebook must sum to the number of (unpadded) rows
    cs_batch = (new_state["cluster_size"] - 0.95 * state["cluster_size"]) / 0.05
    assert bool(jnp.all(jnp.abs(cs_batch.sum(-1) - b * n) < 1e-3))

    print("KERNEL_OK")
</pallas_src>

<mosaic_0001>
module attributes {stable_mosaic.version = 11 : i64} {
  func.func @_kvb_kernel(%arg0: i32, %arg1: i32, %arg2: memref<1x128x32xf32, #tpu.memory_space<vmem>>, %arg3: memref<1x16x32xbf16, #tpu.memory_space<vmem>>, %arg4: memref<1x8x16xbf16, #tpu.memory_space<vmem>>, %arg5: memref<1x8x16xbf16, #tpu.memory_space<vmem>>, %arg6: memref<1x16x1xf32, #tpu.memory_space<vmem>>, %arg7: memref<1x8x128xf32, #tpu.memory_space<vmem>>, %arg8: memref<1x16x1xf32, #tpu.memory_space<vmem>>, %arg9: memref<1x16x32xf32, #tpu.memory_space<vmem>>) attributes {dimension_semantics = [#tpu.dimension_semantics<parallel>, #tpu.dimension_semantics<arbitrary>], iteration_bounds = array<i64: 4, 1>, scalar_prefetch = 0 : i64, scratch_operands = 0 : i64, tpu.core_type = #tpu.core_type<tc>, window_params = [{transform_indices = @transform_0, window_bounds = array<i64: 1, 128, 32>}, {pipeline_mode = #tpu.pipeline_mode<synchronous>, transform_indices = @transform_1, window_bounds = array<i64: 1, 16, 32>}, {pipeline_mode = #tpu.pipeline_mode<synchronous>, transform_indices = @transform_2, window_bounds = array<i64: 1, 8, 16>}, {pipeline_mode = #tpu.pipeline_mode<synchronous>, transform_indices = @transform_3, window_bounds = array<i64: 1, 8, 16>}, {pipeline_mode = #tpu.pipeline_mode<synchronous>, transform_indices = @transform_4, window_bounds = array<i64: 1, 16, 1>}, {transform_indices = @transform_5, window_bounds = array<i64: 1, 8, 128>}, {pipeline_mode = #tpu.pipeline_mode<synchronous>, transform_indices = @transform_6, window_bounds = array<i64: 1, 16, 1>}, {pipeline_mode = #tpu.pipeline_mode<synchronous>, transform_indices = @transform_7, window_bounds = array<i64: 1, 16, 32>}]} {
    %c0_i32 = arith.constant 0 : i32
    %0 = arith.cmpi eq, %arg1, %c0_i32 : i32
    %1 = arith.extui %0 : i1 to i32
    %c0_i32_0 = arith.constant 0 : i32
    %2 = arith.cmpi ne, %1, %c0_i32_0 : i32
    scf.if %2 {
      %cst_39 = arith.constant 0.000000e+00 : f32
      %78 = vector.broadcast %cst_39 : f32 to vector<1x16x1xf32>
      %c0_40 = arith.constant 0 : index
      %c0_41 = arith.constant 0 : index
      %c0_42 = arith.constant 0 : index
      %79 = vector.load %arg8[%c0_40, %c0_41, %c0_42] : memref<1x16x1xf32, #tpu.memory_space<vmem>>, vector<1x16x1xf32>
      tpu.vector_store %arg8[%c0_40, %c0_41, %c0_42], %78 {strides = array<i32>} : memref<1x16x1xf32, #tpu.memory_space<vmem>>, vector<1x16x1xf32>,
      %cst_43 = arith.constant 0.000000e+00 : f32
      %80 = vector.broadcast %cst_43 : f32 to vector<1x16x32xf32>
      %c0_44 = arith.constant 0 : index
      %c0_45 = arith.constant 0 : index
      %c0_46 = arith.constant 0 : index
      %81 = vector.load %arg9[%c0_44, %c0_45, %c0_46] : memref<1x16x32xf32, #tpu.memory_space<vmem>>, vector<1x16x32xf32>
      tpu.vector_store %arg9[%c0_44, %c0_45, %c0_46], %80 {strides = array<i32>} : memref<1x16x32xf32, #tpu.memory_space<vmem>>, vector<1x16x32xf32>,
    } else {
    }
    %c0 = arith.constant 0 : index
    %c0_1 = arith.constant 0 : index
    %c0_2 = arith.constant 0 : index
    %3 = vector.load %arg2[%c0, %c0_1, %c0_2] : memref<1x128x32xf32, #tpu.memory_space<vmem>>, vector<1x128x32xf32>
    %4 = vector.shape_cast %3 : vector<1x128x32xf32> to vector<128x32xf32>
    %c0_3 = arith.constant 0 : index
    %c0_4 = arith.constant 0 : index
    %c0_5 = arith.constant 0 : index
    %5 = vector.load %arg3[%c0_3, %c0_4, %c0_5] : memref<1x16x32xbf16, #tpu.memory_space<vmem>>, vector<1x16x32xbf16>
    %6 = vector.shape_cast %5 : vector<1x16x32xbf16> to vector<16x32xbf16>
    %c0_6 = arith.constant 0 : index
    %c0_7 = arith.constant 0 : index
    %c0_8 = arith.constant 0 : index
    %7 = vector.load %arg6[%c0_6, %c0_7, %c0_8] : memref<1x16x1xf32, #tpu.memory_space<vmem>>, vector<1x16x1xf32>
    %8 = vector.shape_cast %7 : vector<1x16x1xf32> to vector<16x1xf32>
    %9 = arith.truncf %4 : vector<128x32xf32> to vector<128x32xbf16>
    %10 = arith.extf %9 : vector<128x32xbf16> to vector<128x32xf32>
    %11 = arith.subf %4, %10 : vector<128x32xf32>
    %12 = arith.truncf %11 : vector<128x32xf32> to vector<128x32xbf16>
    %cst = arith.constant dense<0.000000e+00> : vector<16x128xf32>
    %13 = tpu.matmul %6, %9, %cst {dimension_numbers = #tpu.dot_dimension_numbers<[1], [1], [0], [0], [0, 0, 1, 0], [], []>} : vector<16x32xbf16>, vector<128x32xbf16>, vector<16x128xf32> -> vector<16x128xf32>
    %14 = vector.broadcast %8 : vector<16x1xf32> to vector<16x128xf32>
    %15 = arith.subf %13, %14 : vector<16x128xf32>
    %16 = tpu.iota {dimensions = array<i32: 0>} : vector<16x128xi32>
    %17 = tpu.bitcast %15 : vector<16x128xf32> -> vector<16x128xi32>
    %c0_i32_9 = arith.constant 0 : i32
    %18 = vector.broadcast %c0_i32_9 : i32 to vector<16x128xi32>
    %19 = arith.cmpi slt, %17, %18 : vector<16x128xi32>
    %c2147483647_i32 = arith.constant 2147483647 : i32
    %20 = vector.broadcast %c2147483647_i32 : i32 to vector<16x128xi32>
    %21 = arith.xori %17, %20 : vector<16x128xi32>
    %22 = arith.select %19, %21, %17 : vector<16x128xi1>, vector<16x128xi32>
    %23 = tpu.iota {dimensions = array<i32: 0>} : vector<16x1xi32>
    %c15_i32 = arith.constant 15 : i32
    %24 = vector.broadcast %c15_i32 : i32 to vector<16x1xi32>
    %25 = arith.subi %24, %23 : vector<16x1xi32>
    %c-16_i32 = arith.constant -16 : i32
    %26 = vector.broadcast %c-16_i32 : i32 to vector<16x128xi32>
    %27 = arith.andi %22, %26 : vector<16x128xi32>
    %28 = vector.broadcast %25 : vector<16x1xi32> to vector<16x128xi32>
    %29 = arith.ori %27, %28 : vector<16x128xi32>
    %cst_10 = arith.constant dense<-2147483648> : vector<128xi32>
    %30 = vector.multi_reduction <maxsi>, %29, %cst_10 [0] : vector<16x128xi32> to vector<128xi32>
    %31 = vector.shape_cast %30 : vector<128xi32> to vector<1x128xi32>
    %c15_i32_11 = arith.constant 15 : i32
    %32 = vector.broadcast %c15_i32_11 : i32 to vector<1x128xi32>
    %33 = arith.andi %31, %32 : vector<1x128xi32>
    %c15_i32_12 = arith.constant 15 : i32
    %34 = vector.broadcast %c15_i32_12 : i32 to vector<1x128xi32>
    %35 = arith.subi %34, %33 : vector<1x128xi32>
    %36 = vector.broadcast %35 : vector<1x128xi32> to vector<16x128xi32>
    %37 = arith.cmpi eq, %16, %36 : vector<16x128xi32>
    %c128_i32 = arith.constant 128 : i32
    %38 = arith.muli %arg1, %c128_i32 : i32
    %39 = tpu.iota {dimensions = array<i32: 1>} : vector<1x128xi32>
    %40 = vector.broadcast %38 : i32 to vector<1x128xi32>
    %41 = arith.addi %40, %39 : vector<1x128xi32>
    %c16_i32 = arith.constant 16 : i32
    %42 = vector.broadcast %c16_i32 : i32 to vector<1x128xi32>
    %43 = arith.cmpi slt, %41, %42 : vector<1x128xi32>
    %44 = vector.broadcast %43 : vector<1x128xi1> to vector<16x128xi1>
    %45 = arith.andi %37, %44 : vector<16x128xi1>
    %46 = arith.extui %45 : vector<16x128xi1> to vector<16x128xi32>
    %47 = arith.sitofp %46 : vector<16x128xi32> to vector<16x128xf32>
    %48 = arith.truncf %47 : vector<16x128xf32> to vector<16x128xbf16>
    %c0_13 = arith.constant 0 : index
    %c0_14 = arith.constant 0 : index
    %c0_15 = arith.constant 0 : index
    %49 = vector.load %arg4[%c0_13, %c0_14, %c0_15] : memref<1x8x16xbf16, #tpu.memory_space<vmem>>, vector<1x8x16xbf16>
    %50 = vector.shape_cast %49 : vector<1x8x16xbf16> to vector<8x16xbf16>
    %c0_16 = arith.constant 0 : index
    %c0_17 = arith.constant 0 : index
    %c0_18 = arith.constant 0 : index
    %51 = vector.load %arg5[%c0_16, %c0_17, %c0_18] : memref<1x8x16xbf16, #tpu.memory_space<vmem>>, vector<1x8x16xbf16>
    %52 = vector.shape_cast %51 : vector<1x8x16xbf16> to vector<8x16xbf16>
    %cst_19 = arith.constant dense<0.000000e+00> : vector<8x128xf32>
    %53 = tpu.matmul %50, %48, %cst_19 {dimension_numbers = #tpu.dot_dimension_numbers<[1], [0], [0], [1], [0, 0, 1, 1], [], []>} : vector<8x16xbf16>, vector<16x128xbf16>, vector<8x128xf32> -> vector<8x128xf32>
    %cst_20 = arith.constant dense<0.000000e+00> : vector<8x128xf32>
    %54 = tpu.matmul %52, %48, %cst_20 {dimension_numbers = #tpu.dot_dimension_numbers<[1], [0], [0], [1], [0, 0, 1, 1], [], []>} : vector<8x16xbf16>, vector<16x128xbf16>, vector<8x128xf32> -> vector<8x128xf32>
    %55 = arith.addf %53, %54 : vector<8x128xf32>
    %c0_21 = arith.constant 0 : index
    %c0_22 = arith.constant 0 : index
    %c0_23 = arith.constant 0 : index
    %56 = vector.load %arg7[%c0_21, %c0_22, %c0_23] : memref<1x8x128xf32, #tpu.memory_space<vmem>>, vector<1x8x128xf32>
    %57 = vector.shape_cast %56 : vector<1x8x128xf32> to vector<8x128xf32>
    %58 = vector.shape_cast %55 : vector<8x128xf32> to vector<1x8x128xf32>
    tpu.vector_store %arg7[%c0_21, %c0_22, %c0_23], %58 {strides = array<i32>} : memref<1x8x128xf32, #tpu.memory_space<vmem>>, vector<1x8x128xf32>,
    %c0_24 = arith.constant 0 : index
    %c0_25 = arith.constant 0 : index
    %c0_26 = arith.constant 0 : index
    %59 = vector.load %arg8[%c0_24, %c0_25, %c0_26] : memref<1x16x1xf32, #tpu.memory_space<vmem>>, vector<1x16x1xf32>
    %60 = vector.shape_cast %59 : vector<1x16x1xf32> to vector<16x1xf32>
    %61 = arith.extui %45 : vector<16x128xi1> to vector<16x128xi32>
    %62 = arith.sitofp %61 : vector<16x128xi32> to vector<16x128xf32>
    %cst_27 = arith.constant dense<0.000000e+00> : vector<16xf32>
    %63 = vector.multi_reduction <add>, %62, %cst_27 [1] : vector<16x128xf32> to vector<16xf32>
    %64 = vector.shape_cast %63 : vector<16xf32> to vector<16x1xf32>
    %65 = arith.addf %60, %64 : vector<16x1xf32>
    %c0_28 = arith.constant 0 : index
    %c0_29 = arith.constant 0 : index
    %c0_30 = arith.constant 0 : index
    %66 = vector.load %arg8[%c0_28, %c0_29, %c0_30] : memref<1x16x1xf32, #tpu.memory_space<vmem>>, vector<1x16x1xf32>
    %67 = vector.shape_cast %66 : vector<1x16x1xf32> to vector<16x1xf32>
    %68 = vector.shape_cast %65 : vector<16x1xf32> to vector<1x16x1xf32>
    tpu.vector_store %arg8[%c0_28, %c0_29, %c0_30], %68 {strides = array<i32>} : memref<1x16x1xf32, #tpu.memory_space<vmem>>, vector<1x16x1xf32>,
    %c0_31 = arith.constant 0 : index
    %c0_32 = arith.constant 0 : index
    %c0_33 = arith.constant 0 : index
    %69 = vector.load %arg9[%c0_31, %c0_32, %c0_33] : memref<1x16x32xf32, #tpu.memory_space<vmem>>, vector<1x16x32xf32>
    %70 = vector.shape_cast %69 : vector<1x16x32xf32> to vector<16x32xf32>
    %cst_34 = arith.constant dense<0.000000e+00> : vector<16x32xf32>
    %71 = tpu.matmul %48, %9, %cst_34 {dimension_numbers = #tpu.dot_dimension_numbers<[1], [0], [0], [1], [0, 0, 1, 1], [], []>} : vector<16x128xbf16>, vector<128x32xbf16>, vector<16x32xf32> -> vector<16x32xf32>
    %cst_35 = arith.constant dense<0.000000e+00> : vector<16x32xf32>
    %72 = tpu.matmul %48, %12, %cst_35 {dimension_numbers = #tpu.dot_dimension_numbers<[1], [0], [0], [1], [0, 0, 1, 1], [], []>} : vector<16x128xbf16>, vector<128x32xbf16>, vector<16x32xf32> -> vector<16x32xf32>
    %73 = arith.addf %71, %72 : vector<16x32xf32>
    %74 = arith.addf %70, %73 : vector<16x32xf32>
    %c0_36 = arith.constant 0 : index
    %c0_37 = arith.constant 0 : index
    %c0_38 = arith.constant 0 : index
    %75 = vector.load %arg9[%c0_36, %c0_37, %c0_38] : memref<1x16x32xf32, #tpu.memory_space<vmem>>, vector<1x16x32xf32>
    %76 = vector.shape_cast %75 : vector<1x16x32xf32> to vector<16x32xf32>
    %77 = vector.shape_cast %74 : vector<16x32xf32> to vector<1x16x32xf32>
    tpu.vector_store %arg9[%c0_36, %c0_37, %c0_38], %77 {strides = array<i32>} : memref<1x16x32xf32, #tpu.memory_space<vmem>>, vector<1x16x32xf32>,
    return
  }
  func.func @transform_0(%arg0: i32, %arg1: i32) -> (i32, i32, i32) {
    %c0_i32 = arith.constant 0 : i32
    %c0_i32_0 = arith.constant 0 : i32
    return %arg0, %arg1, %c0_i32 : i32, i32, i32
  }
  func.func @transform_1(%arg0: i32, %arg1: i32) -> (i32, i32, i32) {
    %c0_i32 = arith.constant 0 : i32
    %c0_i32_0 = arith.constant 0 : i32
    %c0_i32_1 = arith.constant 0 : i32
    return %arg0, %c0_i32, %c0_i32_0 : i32, i32, i32
  }
  func.func @transform_2(%arg0: i32, %arg1: i32) -> (i32, i32, i32) {
    %c0_i32 = arith.constant 0 : i32
    %c0_i32_0 = arith.constant 0 : i32
    %c0_i32_1 = arith.constant 0 : i32
    return %arg0, %c0_i32, %c0_i32_0 : i32, i32, i32
  }
  func.func @transform_3(%arg0: i32, %arg1: i32) -> (i32, i32, i32) {
    %c0_i32 = arith.constant 0 : i32
    %c0_i32_0 = arith.constant 0 : i32
    %c0_i32_1 = arith.constant 0 : i32
    return %arg0, %c0_i32, %c0_i32_0 : i32, i32, i32
  }
  func.func @transform_4(%arg0: i32, %arg1: i32) -> (i32, i32, i32) {
    %c0_i32 = arith.constant 0 : i32
    %c0_i32_0 = arith.constant 0 : i32
    %c0_i32_1 = arith.constant 0 : i32
    return %arg0, %c0_i32, %c0_i32_0 : i32, i32, i32
  }
  func.func @transform_5(%arg0: i32, %arg1: i32) -> (i32, i32, i32) {
    %c0_i32 = arith.constant 0 : i32
    %c0_i32_0 = arith.constant 0 : i32
    return %arg0, %c0_i32, %arg1 : i32, i32, i32
  }
  func.func @transform_6(%arg0: i32, %arg1: i32) -> (i32, i32, i32) {
    %c0_i32 = arith.constant 0 : i32
    %c0_i32_0 = arith.constant 0 : i32
    %c0_i32_1 = arith.constant 0 : i32
    return %arg0, %c0_i32, %c0_i32_0 : i32, i32, i32
  }
  func.func @transform_7(%arg0: i32, %arg1: i32) -> (i32, i32, i32) {
    %c0_i32 = arith.constant 0 : i32
    %c0_i32_0 = arith.constant 0 : i32
    %c0_i32_1 = arith.constant 0 : i32
    return %arg0, %c0_i32, %c0_i32_0 : i32, i32, i32
  }
}

module attributes {stable_mosaic.version = 11 : i64} {
  func.func @_kvb_kernel(%arg0: i32, %arg1: i32, %arg2: memref<1x128x32xf32, #tpu.memory_space<vmem>>, %arg3: memref<1x16x32xbf16, #tpu.memory_space<vmem>>, %arg4: memref<1x8x16xbf16, #tpu.memory_space<vmem>>, %arg5: memref<1x8x16xbf16, #tpu.memory_space<vmem>>, %arg6: memref<1x16x1xf32, #tpu.memory_space<vmem>>, %arg7: memref<1x8x128xf32, #tpu.memory_space<vmem>>, %arg8: memref<1x16x1xf32, #tpu.memory_space<vmem>>, %arg9: memref<1x16x32xf32, #tpu.memory_space<vmem>>) attributes {dimension_semantics = [#tpu.dimension_semantics<parallel>, #tpu.dimension_semantics<arbitrary>], iteration_bounds = array<i64: 4, 1>, scalar_prefetch = 0 : i64, scratch_operands = 0 : i64, tpu.core_type = #tpu.core_type<tc>, window_params = [{transform_indices = @transform_0, window_bounds = array<i64: 1, 128, 32>}, {transform_indices = @transform_1, window_bounds = array<i64: 1, 16, 32>}, {transform_indices = @transform_2, window_bounds = array<i64: 1, 8, 16>}, {transform_indices = @transform_3, window_bounds = array<i64: 1, 8, 16>}, {transform_indices = @transform_4, window_bounds = array<i64: 1, 16, 1>}, {transform_indices = @transform_5, window_bounds = array<i64: 1, 8, 128>}, {transform_indices = @transform_6, window_bounds = array<i64: 1, 16, 1>}, {transform_indices = @transform_7, window_bounds = array<i64: 1, 16, 32>}]} {
    %c0_i32 = arith.constant 0 : i32
    %0 = arith.cmpi eq, %arg1, %c0_i32 : i32
    %1 = arith.extui %0 : i1 to i32
    %c0_i32_0 = arith.constant 0 : i32
    %2 = arith.cmpi ne, %1, %c0_i32_0 : i32
    scf.if %2 {
      %cst_39 = arith.constant 0.000000e+00 : f32
      %78 = vector.broadcast %cst_39 : f32 to vector<1x16x1xf32>
      %c0_40 = arith.constant 0 : index
      %c0_41 = arith.constant 0 : index
      %c0_42 = arith.constant 0 : index
      %79 = vector.load %arg8[%c0_40, %c0_41, %c0_42] : memref<1x16x1xf32, #tpu.memory_space<vmem>>, vector<1x16x1xf32>
      tpu.vector_store %arg8[%c0_40, %c0_41, %c0_42], %78 {strides = array<i32>} : memref<1x16x1xf32, #tpu.memory_space<vmem>>, vector<1x16x1xf32>,
      %cst_43 = arith.constant 0.000000e+00 : f32
      %80 = vector.broadcast %cst_43 : f32 to vector<1x16x32xf32>
      %c0_44 = arith.constant 0 : index
      %c0_45 = arith.constant 0 : index
      %c0_46 = arith.constant 0 : index
      %81 = vector.load %arg9[%c0_44, %c0_45, %c0_46] : memref<1x16x32xf32, #tpu.memory_space<vmem>>, vector<1x16x32xf32>
      tpu.vector_store %arg9[%c0_44, %c0_45, %c0_46], %80 {strides = array<i32>} : memref<1x16x32xf32, #tpu.memory_space<vmem>>, vector<1x16x32xf32>,
    } else {
    }
    %c0 = arith.constant 0 : index
    %c0_1 = arith.constant 0 : index
    %c0_2 = arith.constant 0 : index
    %3 = vector.load %arg2[%c0, %c0_1, %c0_2] : memref<1x128x32xf32, #tpu.memory_space<vmem>>, vector<1x128x32xf32>
    %4 = vector.shape_cast %3 : vector<1x128x32xf32> to vector<128x32xf32>
    %c0_3 = arith.constant 0 : index
    %c0_4 = arith.constant 0 : index
    %c0_5 = arith.constant 0 : index
    %5 = vector.load %arg3[%c0_3, %c0_4, %c0_5] : memref<1x16x32xbf16, #tpu.memory_space<vmem>>, vector<1x16x32xbf16>
    %6 = vector.shape_cast %5 : vector<1x16x32xbf16> to vector<16x32xbf16>
    %c0_6 = arith.constant 0 : index
    %c0_7 = arith.constant 0 : index
    %c0_8 = arith.constant 0 : index
    %7 = vector.load %arg6[%c0_6, %c0_7, %c0_8] : memref<1x16x1xf32, #tpu.memory_space<vmem>>, vector<1x16x1xf32>
    %8 = vector.shape_cast %7 : vector<1x16x1xf32> to vector<16x1xf32>
    %9 = arith.truncf %4 : vector<128x32xf32> to vector<128x32xbf16>
    %10 = arith.extf %9 : vector<128x32xbf16> to vector<128x32xf32>
    %11 = arith.subf %4, %10 : vector<128x32xf32>
    %12 = arith.truncf %11 : vector<128x32xf32> to vector<128x32xbf16>
    %cst = arith.constant dense<0.000000e+00> : vector<16x128xf32>
    %13 = tpu.matmul %6, %9, %cst {dimension_numbers = #tpu.dot_dimension_numbers<[1], [1], [0], [0], [0, 0, 1, 0], [], []>} : vector<16x32xbf16>, vector<128x32xbf16>, vector<16x128xf32> -> vector<16x128xf32>
    %14 = vector.broadcast %8 : vector<16x1xf32> to vector<16x128xf32>
    %15 = arith.subf %13, %14 : vector<16x128xf32>
    %16 = tpu.iota {dimensions = array<i32: 0>} : vector<16x128xi32>
    %17 = tpu.bitcast %15 : vector<16x128xf32> -> vector<16x128xi32>
    %c0_i32_9 = arith.constant 0 : i32
    %18 = vector.broadcast %c0_i32_9 : i32 to vector<16x128xi32>
    %19 = arith.cmpi slt, %17, %18 : vector<16x128xi32>
    %c2147483647_i32 = arith.constant 2147483647 : i32
    %20 = vector.broadcast %c2147483647_i32 : i32 to vector<16x128xi32>
    %21 = arith.xori %17, %20 : vector<16x128xi32>
    %22 = arith.select %19, %21, %17 : vector<16x128xi1>, vector<16x128xi32>
    %23 = tpu.iota {dimensions = array<i32: 0>} : vector<16x1xi32>
    %c15_i32 = arith.constant 15 : i32
    %24 = vector.broadcast %c15_i32 : i32 to vector<16x1xi32>
    %25 = arith.subi %24, %23 : vector<16x1xi32>
    %c-16_i32 = arith.constant -16 : i32
    %26 = vector.broadcast %c-16_i32 : i32 to vector<16x128xi32>
    %27 = arith.andi %22, %26 : vector<16x128xi32>
    %28 = vector.broadcast %25 : vector<16x1xi32> to vector<16x128xi32>
    %29 = arith.ori %27, %28 : vector<16x128xi32>
    %cst_10 = arith.constant dense<-2147483648> : vector<128xi32>
    %30 = vector.multi_reduction <maxsi>, %29, %cst_10 [0] : vector<16x128xi32> to vector<128xi32>
    %31 = vector.shape_cast %30 : vector<128xi32> to vector<1x128xi32>
    %c15_i32_11 = arith.constant 15 : i32
    %32 = vector.broadcast %c15_i32_11 : i32 to vector<1x128xi32>
    %33 = arith.andi %31, %32 : vector<1x128xi32>
    %c15_i32_12 = arith.constant 15 : i32
    %34 = vector.broadcast %c15_i32_12 : i32 to vector<1x128xi32>
    %35 = arith.subi %34, %33 : vector<1x128xi32>
    %36 = vector.broadcast %35 : vector<1x128xi32> to vector<16x128xi32>
    %37 = arith.cmpi eq, %16, %36 : vector<16x128xi32>
    %c128_i32 = arith.constant 128 : i32
    %38 = arith.muli %arg1, %c128_i32 : i32
    %39 = tpu.iota {dimensions = array<i32: 1>} : vector<1x128xi32>
    %40 = vector.broadcast %38 : i32 to vector<1x128xi32>
    %41 = arith.addi %40, %39 : vector<1x128xi32>
    %c16_i32 = arith.constant 16 : i32
    %42 = vector.broadcast %c16_i32 : i32 to vector<1x128xi32>
    %43 = arith.cmpi slt, %41, %42 : vector<1x128xi32>
    %44 = vector.broadcast %43 : vector<1x128xi1> to vector<16x128xi1>
    %45 = arith.andi %37, %44 : vector<16x128xi1>
    %46 = arith.extui %45 : vector<16x128xi1> to vector<16x128xi32>
    %47 = arith.sitofp %46 : vector<16x128xi32> to vector<16x128xf32>
    %48 = arith.truncf %47 : vector<16x128xf32> to vector<16x128xbf16>
    %c0_13 = arith.constant 0 : index
    %c0_14 = arith.constant 0 : index
    %c0_15 = arith.constant 0 : index
    %49 = vector.load %arg4[%c0_13, %c0_14, %c0_15] : memref<1x8x16xbf16, #tpu.memory_space<vmem>>, vector<1x8x16xbf16>
    %50 = vector.shape_cast %49 : vector<1x8x16xbf16> to vector<8x16xbf16>
    %c0_16 = arith.constant 0 : index
    %c0_17 = arith.constant 0 : index
    %c0_18 = arith.constant 0 : index
    %51 = vector.load %arg5[%c0_16, %c0_17, %c0_18] : memref<1x8x16xbf16, #tpu.memory_space<vmem>>, vector<1x8x16xbf16>
    %52 = vector.shape_cast %51 : vector<1x8x16xbf16> to vector<8x16xbf16>
    %cst_19 = arith.constant dense<0.000000e+00> : vector<8x128xf32>
    %53 = tpu.matmul %50, %48, %cst_19 {dimension_numbers = #tpu.dot_dimension_numbers<[1], [0], [0], [1], [0, 0, 1, 1], [], []>} : vector<8x16xbf16>, vector<16x128xbf16>, vector<8x128xf32> -> vector<8x128xf32>
    %cst_20 = arith.constant dense<0.000000e+00> : vector<8x128xf32>
    %54 = tpu.matmul %52, %48, %cst_20 {dimension_numbers = #tpu.dot_dimension_numbers<[1], [0], [0], [1], [0, 0, 1, 1], [], []>} : vector<8x16xbf16>, vector<16x128xbf16>, vector<8x128xf32> -> vector<8x128xf32>
    %55 = arith.addf %53, %54 : vector<8x128xf32>
    %c0_21 = arith.constant 0 : index
    %c0_22 = arith.constant 0 : index
    %c0_23 = arith.constant 0 : index
    %56 = vector.load %arg7[%c0_21, %c0_22, %c0_23] : memref<1x8x128xf32, #tpu.memory_space<vmem>>, vector<1x8x128xf32>
    %57 = vector.shape_cast %56 : vector<1x8x128xf32> to vector<8x128xf32>
    %58 = vector.shape_cast %55 : vector<8x128xf32> to vector<1x8x128xf32>
    tpu.vector_store %arg7[%c0_21, %c0_22, %c0_23], %58 {strides = array<i32>} : memref<1x8x128xf32, #tpu.memory_space<vmem>>, vector<1x8x128xf32>,
    %c0_24 = arith.constant 0 : index
    %c0_25 = arith.constant 0 : index
    %c0_26 = arith.constant 0 : index
    %59 = vector.load %arg8[%c0_24, %c0_25, %c0_26] : memref<1x16x1xf32, #tpu.memory_space<vmem>>, vector<1x16x1xf32>
    %60 = vector.shape_cast %59 : vector<1x16x1xf32> to vector<16x1xf32>
    %61 = arith.extui %45 : vector<16x128xi1> to vector<16x128xi32>
    %62 = arith.sitofp %61 : vector<16x128xi32> to vector<16x128xf32>
    %cst_27 = arith.constant dense<0.000000e+00> : vector<16xf32>
    %63 = vector.multi_reduction <add>, %62, %cst_27 [1] : vector<16x128xf32> to vector<16xf32>
    %64 = vector.shape_cast %63 : vector<16xf32> to vector<16x1xf32>
    %65 = arith.addf %60, %64 : vector<16x1xf32>
    %c0_28 = arith.constant 0 : index
    %c0_29 = arith.constant 0 : index
    %c0_30 = arith.constant 0 : index
    %66 = vector.load %arg8[%c0_28, %c0_29, %c0_30] : memref<1x16x1xf32, #tpu.memory_space<vmem>>, vector<1x16x1xf32>
    %67 = vector.shape_cast %66 : vector<1x16x1xf32> to vector<16x1xf32>
    %68 = vector.shape_cast %65 : vector<16x1xf32> to vector<1x16x1xf32>
    tpu.vector_store %arg8[%c0_28, %c0_29, %c0_30], %68 {strides = array<i32>} : memref<1x16x1xf32, #tpu.memory_space<vmem>>, vector<1x16x1xf32>,
    %c0_31 = arith.constant 0 : index
    %c0_32 = arith.constant 0 : index
    %c0_33 = arith.constant 0 : index
    %69 = vector.load %arg9[%c0_31, %c0_32, %c0_33] : memref<1x16x32xf32, #tpu.memory_space<vmem>>, vector<1x16x32xf32>
    %70 = vector.shape_cast %69 : vector<1x16x32xf32> to vector<16x32xf32>
    %cst_34 = arith.constant dense<0.000000e+00> : vector<16x32xf32>
    %71 = tpu.matmul %48, %9, %cst_34 {dimension_numbers = #tpu.dot_dimension_numbers<[1], [0], [0], [1], [0, 0, 1, 1], [], []>} : vector<16x128xbf16>, vector<128x32xbf16>, vector<16x32xf32> -> vector<16x32xf32>
    %cst_35 = arith.constant dense<0.000000e+00> : vector<16x32xf32>
    %72 = tpu.matmul %48, %12, %cst_35 {dimension_numbers = #tpu.dot_dimension_numbers<[1], [0], [0], [1], [0, 0, 1, 1], [], []>} : vector<16x128xbf16>, vector<128x32xbf16>, vector<16x32xf32> -> vector<16x32xf32>
    %73 = arith.addf %71, %72 : vector<16x32xf32>
    %74 = arith.addf %70, %73 : vector<16x32xf32>
    %c0_36 = arith.constant 0 : index
    %c0_37 = arith.constant 0 : index
    %c0_38 = arith.constant 0 : index
    %75 = vector.load %arg9[%c0_36, %c0_37, %c0_38] : memref<1x16x32xf32, #tpu.memory_space<vmem>>, vector<1x16x32xf32>
    %76 = vector.shape_cast %75 : vector<1x16x32xf32> to vector<16x32xf32>
    %77 = vector.shape_cast %74 : vector<16x32xf32> to vector<1x16x32xf32>
    tpu.vector_store %arg9[%c0_36, %c0_37, %c0_38], %77 {strides = array<i32>} : memref<1x16x32xf32, #tpu.memory_space<vmem>>, vector<1x16x32xf32>,
    return
  }
  func.func @transform_0(%arg0: i32, %arg1: i32) -> (i32, i32, i32) {
    %c0_i32 = arith.constant 0 : i32
    %c0_i32_0 = arith.constant 0 : i32
    return %arg0, %arg1, %c0_i32 : i32, i32, i32
  }
  func.func @transform_1(%arg0: i32, %arg1: i32) -> (i32, i32, i32) {
    %c0_i32 = arith.constant 0 : i32
    %c0_i32_0 = arith.constant 0 : i32
    %c0_i32_1 = arith.constant 0 : i32
    return %arg0, %c0_i32, %c0_i32_0 : i32, i32, i32
  }
  func.func @transform_2(%arg0: i32, %arg1: i32) -> (i32, i32, i32) {
    %c0_i32 = arith.constant 0 : i32
    %c0_i32_0 = arith.constant 0 : i32
    %c0_i32_1 = arith.constant 0 : i32
    return %arg0, %c0_i32, %c0_i32_0 : i32, i32, i32
  }
  func.func @transform_3(%arg0: i32, %arg1: i32) -> (i32, i32, i32) {
    %c0_i32 = arith.constant 0 : i32
    %c0_i32_0 = arith.constant 0 : i32
    %c0_i32_1 = arith.constant 0 : i32
    return %arg0, %c0_i32, %c0_i32_0 : i32, i32, i32
  }
  func.func @transform_4(%arg0: i32, %arg1: i32) -> (i32, i32, i32) {
    %c0_i32 = arith.constant 0 : i32
    %c0_i32_0 = arith.constant 0 : i32
    %c0_i32_1 = arith.constant 0 : i32
    return %arg0, %c0_i32, %c0_i32_0 : i32, i32, i32
  }
  func.func @transform_5(%arg0: i32, %arg1: i32) -> (i32, i32, i32) {
    %c0_i32 = arith.constant 0 : i32
    %c0_i32_0 = arith.constant 0 : i32
    return %arg0, %c0_i32, %arg1 : i32, i32, i32
  }
  func.func @transform_6(%arg0: i32, %arg1: i32) -> (i32, i32, i32) {
    %c0_i32 = arith.constant 0 : i32
    %c0_i32_0 = arith.constant 0 : i32
    %c0_i32_1 = arith.constant 0 : i32
    return %arg0, %c0_i32, %c0_i32_0 : i32, i32, i32
  }
  func.func @transform_7(%arg0: i32, %arg1: i32) -> (i32, i32, i32) {
    %c0_i32 = arith.constant 0 : i32
    %c0_i32_0 = arith.constant 0 : i32
    %c0_i32_1 = arith.constant 0 : i32
    return %arg0, %c0_i32, %c0_i32_0 : i32, i32, i32
  }
}

</mosaic_0001>

<bundles_post_ra>
// kernel: tpu_custom_call.1
= control target key start
LH: loop header
LB: loop body
LE: loop exit
PB: predicated region body
PF: predicated region fallthrough
CT: control target
= control target key end

     0   :  { %13 = vsyncpa [#allocation3], 0  ;;  %s1768_s0 = inlined_call_operand.vmem [shape: f32[4,128,32], index: 0, kind: input, shape index: {}]   ;;  %s1769_s1 = inlined_call_operand.vmem [shape: bf16[4,16,32], index: 1, kind: input, shape index: {}]   ;;  %s1770_s2 = inlined_call_operand.vmem [shape: bf16[4,8,16], index: 2, kind: input, shape index: {}]   ;;  %s1771_s3 = inlined_call_operand.vmem [shape: bf16[4,8,16], index: 3, kind: input, shape index: {}]   ;;  %s1772_s4 = inlined_call_operand.vmem [shape: f32[4,16,1], index: 4, kind: input, shape index: {}]   ;;  %s1773_s5 = inlined_call_operand.hbm [shape: f32[4,8,128], index: 5, kind: output, shape index: {0}]   ;;  %s1774_s6 = inlined_call_operand.vmem [shape: f32[4,16,1], index: 6, kind: output, shape index: {1}]   ;;  %s1775_s7 = inlined_call_operand.hbm [shape: f32[4,16,32], index: 7, kind: output, shape index: {2}]  }
   0x1   :  { %15 = vsyncpa [#allocation3 + $0x1], 0 }
   0x2   :  { %16 = vsyncpa [#allocation5], 0  ;;  %s1377_s24 = smov 0   ;;  %s1379_s25 = smov 0  }
   0x3   :  { %s1381_s26 = smov 0   ;;  %s1383_s27 = smov 0  }
   0x4   :  { %s1385_s28 = smov 0   ;;  %s1387_s29 = smov 0  }
   0x5 LB: > { %s1006_s30 = sadd.s32 4294967295, %s1327_s29   ;;  %s1007_s8 = sadd.s32 4294967294, %s1327_s29   ;;  %s1327_s29 = sphi %s1387_s29, %s22_s29   ;;  %s1323_s28 = sphi %s1385_s28, %s1786_s28   ;;  %s1319_s27 = sphi %s1383_s27, %s1785_s27   ;;  %s1315_s26 = sphi %s1381_s26, %s1784_s26   ;;  %s1311_s25 = sphi %s1379_s25, %s1783_s25   ;;  %s1307_s24 = sphi %s1377_s24, %s1782_s24  }
   0x6   : > { %s34_s9 = sadd.s32 1, %s1323_s28  ;;  %s175_s10 = sadd.s32 1, %s1315_s26 }
   0x7   : > { %p36_p0 = scmp.ge.s32.totalorder %s34_s9, 4  ;;  %p185_p1 = scmp.ne.s32.totalorder %s1315_s26, %s1311_s25 }
   0x8   : > { %p186_p2 = scmp.eq.s32.totalorder %s1006_s30, 3  ;;  %p191_p3 = scmp.ne.s32.totalorder %s1311_s25, %s1307_s24 }
   0x9   : > { %s1788_s9 = smov (%p36_p0, %s34_s9), 0  ;;  %p192_p5 = scmp.eq.s32.totalorder %s1007_s8, 3 }
   0xa   : > { %p1417_p4 = por %p186_p2, %p185_p1  ;;  %s170_s12 = ssub.s32 %s1323_s28, %s1788_s9 }
   0xb   : > { %p1010_p6 = scmp.ge.s32.totalorder %s1327_s29, 1  ;;  %p173_p7 = scmp.eq.s32.totalorder %s170_s12, 0 }
   0xc   : > { %p1424_p8 = por %p192_p5, %p191_p3  ;;  %p305_p9 = scmp.lt.s32.totalorder %s1327_s29, 5 }
   0xd   : > { %s1430_s14 = scalar_select %p173_p7, %s1315_s26, %s175_s10  }
   0xe   : > { %p306_p10 = pnand %p1010_p6, %p305_p9 }
   0xf   : > { %p365_p11 = scmp.lt.s32.totalorder (!%p306_p10), %s1319_s27, 3  ;;  %vm405_vm0 = vcmask (!%p306_p10), 261120   ;;  %v1329_v0 = vmov (!%p306_p10), 0.0   ;;  %vm1330_vm1 = vmmov (!%p306_p10), 0   ;;  %v1331_v1 = vmov (!%p306_p10), 0   ;;  %s1333_s23 = smov (!%p306_p10), [#allocation2]  }
  0x10   : > { %309 = sbr.rel (%p306_p10) target bundleno = 641 (0x281), region = 40  ;;  %1078 = vmatprep.subr.bf16.mxu0 (!%p306_p10), %v1329_v0  ;;  %406 = vst.msk [vmem:[#allocation4] sm:$0xff] (!%p306_p10), %vm405_vm0, %v1329_v0  ;;  %407 = vst.msk [vmem:[#allocation4 + $0x8] sm:$0xff] (!%p306_p10), %vm405_vm0, %v1329_v0  ;;  %1094 = vmatprep.mubr.msk.bf16.mxu0 (!%p306_p10), %vm1330_vm1, %v1329_v0  ;;  %vm402_vm2 = vcmask (!%p306_p10), 7168   ;;  %v562_v37 = vlaneseq (!%p306_p10)  ;;  %vm611_vm15 = vcmask (!%p306_p10), 130048   ;;  %s1221_s8 = sshll.u32 (!%p306_p10), %s1333_s23, 4  ;;  %s1222_s8 = int_to_ptr.vmem [resolvable:$false] %s1221_s8 }
  0x11   : > { %1215 = vset.pattern.permute.xlu0 (!%p306_p10), %v1331_v1  ;;  %1104 = vmatprep.subr.bf16.mxu1 (!%p306_p10), %v1329_v0 }
  0x12   : > { %1106 = vmatprep.mubr.msk.bf16.mxu1 (!%p306_p10), %vm1330_vm1, %v1329_v0  ;;  %v563_v39 = vshrl.u32 (!%p306_p10), %v562_v37, 7  ;;  %v596_v1 = vand.u32 (!%p306_p10), 127, %v562_v37 }
  0x14   : > { %v564_v45 = vadd.s32 (!%p306_p10), 8, %v563_v39  ;;  %v573_v51 = vsub.s32 (!%p306_p10), 15, %v563_v39  ;;  %vm599_vm9 = vcmp.lt.s32.totalorder (!%p306_p10), %v596_v1, 16 }
  0x16   : > { %v574_v53 = vsub.s32 (!%p306_p10), 15, %v564_v45 }
  0x17   : > { %s1441_s15 = scalar_select %p365_p11, %s1319_s27, 3 }
  0x19   : > { %s1042_s16 = sshll.u32 %s1441_s15, 7  ;;  %s1044_s20 = sshll.u32 %s1441_s15, 4 }
  0x1a   : > { %s1450_s19 = scalar_lea.vmem %s1768_s0, %s1042_s16  ;;  %s1043_s21 = sshll.u32 %s1441_s15, 3 }
  0x1b   : > { %v1453_v2 = vld [vmem:[%s1450_s19] sm:$0xff]  ;;  %v1456_v3 = vld [vmem:[%s1450_s19 + $0x8] sm:$0xff]  ;;  %s1467_s30 = scalar_lea.vmem %s1774_s6, %s1044_s20  ;;  %v1470_v5 = vld [vmem:[%s1450_s19 + $0x10] sm:$0xff]  ;;  %s391_s12 = scalar_lea.vmem %s1772_s4, %s1044_s20 }
  0x1c   : > { %v1461_v4 = vpack.c.bf16 %v1456_v3, %v1453_v2  ;;  %v1473_v6 = vld [vmem:[%s1450_s19 + $0x18] sm:$0xff]  ;;  %403 = vst.msk [vmem:[%s1467_s30] sm:$0xff] %vm402_vm2, %v1329_v0  ;;  %404 = vst.msk [vmem:[%s1467_s30 + $0x8] sm:$0xff] %vm402_vm2, %v1329_v0  ;;  %s1489_s18 = scalar_lea.vmem %s1769_s1, %s1043_s21  ;;  %v426_v9 = vld [vmem:[%s391_s12] sm:$0xff]  ;;  %s1037_s16 = sshll.u32 %s1319_s27, 7 }
  0x1d   : > { %v1494_v8 = vpack.c.bf16 %v1473_v6, %v1470_v5  ;;  %552 = vperm.xlu0 %1215, %v426_v9   ;;  %v427_v10 = vld [vmem:[%s391_s12 + $0x8] sm:$0xff]  ;;  %v1499_v12 = vld [vmem:[%s1450_s19 + $0x20] sm:$0xff]  ;;  %v1512_v16 = vld [vmem:[%s1450_s19 + $0x30] sm:$0xff]  ;;  %s1685_s21 = scalar_lea.hbm %s1773_s5, %s1037_s16 }
  0x1e   : > { %v486_v7 = vsel %vm405_vm0, %v1461_v4, 0  ;;  %v1502_v13 = vld [vmem:[%s1450_s19 + $0x28] sm:$0xff]  ;;  %v1515_v17 = vld [vmem:[%s1450_s19 + $0x38] sm:$0xff]  ;;  %v1525_v20 = vld [vmem:[%s1450_s19 + $0x40] sm:$0xff]  ;;  %v436_v9 = vunpack.c.l.bf16 %v1461_v4 }
  0x1f   : > { %1079 = vmatpush3.bf16.xpose.msra.mxu0 %v486_v7  ;;  %v489_v11 = vsel %vm405_vm0, %v1494_v8, 0  ;;  %v1507_v14 = vpack.c.bf16 %v1502_v13, %v1499_v12  ;;  %v1520_v18 = vpack.c.bf16 %v1515_v17, %v1512_v16  ;;  %v1528_v21 = vld [vmem:[%s1450_s19 + $0x48] sm:$0xff]  ;;  %v1538_v24 = vld [vmem:[%s1450_s19 + $0x50] sm:$0xff]  ;;  %v1541_v25 = vld [vmem:[%s1450_s19 + $0x58] sm:$0xff] }
  0x20   : > { %1080 = vmatprep.subr.bf16.mxu0 %v1329_v0  ;;  %v1533_v22 = vpack.c.bf16 %v1528_v21, %v1525_v20  ;;  %v1546_v26 = vpack.c.bf16 %v1541_v25, %v1538_v24  ;;  %v1551_v28 = vld [vmem:[%s1450_s19 + $0x60] sm:$0xff]  ;;  %v1554_v29 = vld [vmem:[%s1450_s19 + $0x68] sm:$0xff]  ;;  %v1564_v32 = vld [vmem:[%s1450_s19 + $0x70] sm:$0xff] }
  0x21   : > { %557 = vperm.xlu0 %1215, %v427_v10   ;;  %v492_v15 = vsel %vm405_vm0, %v1507_v14, 0  ;;  %v495_v19 = vsel %vm405_vm0, %v1520_v18, 0  ;;  %v1559_v30 = vpack.c.bf16 %v1554_v29, %v1551_v28  ;;  %v1567_v33 = vld [vmem:[%s1450_s19 + $0x78] sm:$0xff]  ;;  %v1216_v36 = vld [vmem:[%s1489_s18] sm:$0xff]   ;;  %v437_v10 = vunpack.c.h.bf16 %v1461_v4  ;;  %s1016_s19 = sshll.u32 %s1441_s15, 2  ;;  %s352_s15 = sand.u32 1, %s1311_s25  }
  0x22   : > { %v498_v23 = vsel %vm405_vm0, %v1533_v22, 0  ;;  %v501_v27 = vsel %vm405_vm0, %v1546_v26, 0  ;;  %v1572_v34 = vpack.c.bf16 %v1567_v33, %v1564_v32  ;;  %s382_s22 = scalar_lea.vmem %s1770_s2, %s1016_s19  ;;  %s386_s10 = scalar_lea.vmem %s1771_s3, %s1016_s19  ;;  %v441_v37 = vunpack.c.h.bf16 %v1507_v14 }
  0x23   : > { %v504_v31 = vsel %vm405_vm0, %v1559_v30, 0  ;;  %s1011_s12 = sshll.u32 %s352_s15, 3 }
  0x24   : > { %v507_v35 = vsel %vm405_vm0, %v1572_v34, 0  ;;  %s354_s17 = scalar_lea.vmem [#allocation2], %s1011_s12 }
  0x25   : > { %s818_s18 = sshll.u32 %s354_s17, 4  ;;  %s1687_s18 = int_to_ptr.vmem [resolvable:$true] %s818_s18 }
  0x26   : > { %p1224_p1 = scmp.lt.s32.totalorder %s1687_s18, %s1222_s8 }
  0x27   : > { %1081 = vmatpush3.bf16.xpose.msra.mxu0 %v489_v11 }
  0x28   : > { %1082 = vmatprep.subr.bf16.mxu0 %v1329_v0 }
  0x2f   : > { %1083 = vmatpush3.bf16.xpose.msra.mxu0 %v492_v15 }
  0x30   : > { %1084 = vmatprep.subr.bf16.mxu0 %v1329_v0 }
  0x37   : > { %1085 = vmatpush3.bf16.xpose.msra.mxu0 %v495_v19  ;;  %v452_v19 = vsub.f32 %v1453_v2, %v436_v9 }
  0x38   : > { %1086 = vmatprep.subr.bf16.mxu0 %v1329_v0 }
  0x3f   : > { %1087 = vmatpush3.bf16.xpose.msra.mxu0 %v498_v23  ;;  %v453_v23 = vsub.f32 %v1456_v3, %v437_v10 }
  0x40   : > { %1088 = vmatprep.subr.bf16.mxu0 %v1329_v0 }
  0x47   : > { %1089 = vmatpush3.bf16.xpose.msra.mxu0 %v501_v27  ;;  %v438_v27 = vunpack.c.l.bf16 %v1494_v8 }
  0x48   : > { %1090 = vmatprep.subr.bf16.mxu0 %v1329_v0 }
  0x4f   : > { %1091 = vmatpush3.bf16.xpose.msra.mxu0 %v504_v31  ;;  %v439_v31 = vunpack.c.h.bf16 %v1494_v8 }
  0x50   : > { %1092 = vmatprep.subr.bf16.mxu0 %v1329_v0 }
  0x57   : > { %1093 = vmatpush3.bf16.xpose.msra.mxu0 %v507_v35 }
  0x58   : > { %1098 = vmatprep.subr.bf16.mxu0 %v1329_v0 }
  0x5e   : > { %1095 = vmatmul.mubr.msk.bf16.vlgmr.msra.gmra.mrb[0].mxu0 %vm405_vm0, %v1216_v36  ;;  %v440_v36 = vunpack.c.l.bf16 %v1507_v14 }
  0x5f   : > { %1100 = vmatprep.mubr.msk.bf16.mxu0 %vm1330_vm1, %v1329_v0 }
  0x9c   : > { %v553_v38 = vpop.permute.xlu0 %552 }
  0xa0   : > { %v558_v43 = vpop.permute.xlu0 %557 }
 0x131   : > { %v543_v40 = vpop.f32.mrb[0].mxu0 }
 0x132   : > { %v560_v41 = vsub.f32 %v543_v40, %v553_v38  ;;  %v1096_v42 = vpop.f32.mrb[1].mxu0  ;;  %v1332_v38 = vmov 1.0|1.0   ;;  %v610_v40 = vld [vmem:[%s386_s10] sm:$0xf]  ;;  %s1223_s10 = scalar_lea.vmem %s1222_s8, 256 }
 0x133   : > { %v546_v44 = vpop.f32.mrb[2].mxu0  ;;  %v454_v42 = vsub.f32 %v1470_v5, %v438_v27  ;;  %v443_v5 = vunpack.c.h.bf16 %v1520_v18 }
 0x134   : > { %vm567_vm3 = vcmp.lt.s32.totalorder %v560_v41, 0  ;;  %v569_v46 = vxor.u32 2147483647, %v560_v41  ;;  %v561_v47 = vsub.f32 %v546_v44, %v558_v43  ;;  %v1097_v48 = vpop.f32.mrb[3].mxu0  ;;  %v455_v43 = vsub.f32 %v1473_v6, %v439_v31 }
 0x135   : > { %v442_v48 = vunpack.c.l.bf16 %v1520_v18 }
 0x136   : > { %v571_v49 = vsel %vm567_vm3, %v569_v46, %v560_v41  ;;  %vm568_vm4 = vcmp.lt.s32.totalorder %v561_v47, 0  ;;  %v570_v50 = vxor.u32 2147483647, %v561_v47  ;;  %v468_v41 = vpack.c.bf16 %v453_v23, %v452_v19 }
 0x137   : > { %v575_v52 = vand.u32 4294967280, %v571_v49  ;;  %v457_v46 = vsub.f32 %v1502_v13, %v441_v37  ;;  %v458_v49 = vsub.f32 %v1512_v16, %v442_v48  ;;  %v444_v13 = vunpack.c.l.bf16 %v1533_v22 }
 0x138   : > { %v572_v54 = vsel %vm568_vm4, %v570_v50, %v561_v47  ;;  %v469_v47 = vpack.c.bf16 %v455_v43, %v454_v42  ;;  %v445_v50 = vunpack.c.h.bf16 %v1533_v22 }
 0x139   : > { %v576_v55 = vand.u32 4294967280, %v572_v54  ;;  %v577_v56 = vor.u32 %v575_v52, %v573_v51  ;;  %v446_v51 = vunpack.c.l.bf16 %v1546_v26  ;;  %v447_v52 = vunpack.c.h.bf16 %v1546_v26 }
 0x13a   : > { %v460_v54 = vsub.f32 %v1525_v20, %v444_v13 }
 0x13b   : > { %v578_v57 = vor.u32 %v576_v55, %v574_v53  ;;  %v461_v55 = vsub.f32 %v1528_v21, %v445_v50  ;;  %v462_v16 = vsub.f32 %v1538_v24, %v446_v51  ;;  %v451_v24 = vunpack.c.h.bf16 %v1572_v34 }
 0x13d   : > { %vm579_vm5 = vcmp.gt.s32.totalorder %v577_v56, %v578_v57 }
 0x13e   : > { %v580_v58 = vsel %vm579_vm5, %v577_v56, %v578_v57  ;;  %v472_v56 = vpack.c.bf16 %v461_v55, %v460_v54  ;;  %v448_v57 = vunpack.c.l.bf16 %v1559_v30 }
 0x13f   : > { %v581_v59 = vrot.slane %v580_v58, 4 }
 0x140   : > { %v464_v20 = vsub.f32 %v1551_v28, %v448_v57 }
 0x141   : > { %vm582_vm6 = vcmp.gt.s32.totalorder %v580_v58, %v581_v59 }
 0x142   : > { %v583_v60 = vsel %vm582_vm6, %v580_v58, %v581_v59  ;;  %v449_v58 = vunpack.c.h.bf16 %v1559_v30 }
 0x143   : > { %v584_v61 = vrot.slane %v583_v60, 2 }
 0x144   : > { %v465_v21 = vsub.f32 %v1554_v29, %v449_v58 }
 0x145   : > { %vm585_vm7 = vcmp.gt.s32.totalorder %v583_v60, %v584_v61 }
 0x146   : > { %v586_v62 = vsel %vm585_vm7, %v583_v60, %v584_v61  ;;  %v450_v60 = vunpack.c.l.bf16 %v1572_v34 }
 0x147   : > { %v587_v63 = vrot.slane %v586_v62, 1 }
 0x148   : > { %v466_v61 = vsub.f32 %v1564_v32, %v450_v60 }
 0x149   : > { %vm588_vm8 = vcmp.gt.s32.totalorder %v586_v62, %v587_v63 }
 0x14a   : > { %v589_v7 = vsel %vm588_vm8, %v586_v62, %v587_v63  ;;  %v467_v62 = vsub.f32 %v1567_v33, %v451_v24 }
 0x14b   : > { %v590_v11 = vand.u32 15, %v589_v7 }
 0x14c   : > { %v475_v63 = vpack.c.bf16 %v467_v62, %v466_v61 }
 0x14d   : > { %v591_v15 = vsub.s32 15, %v590_v11 }
 0x14f   : > { %vm592_vm10 = vcmp.eq.s32.totalorder %v563_v39, %v591_v15  ;;  %vm593_vm11 = vcmp.eq.s32.totalorder %v564_v45, %v591_v15  ;;  %v609_v39 = vld [vmem:[%s382_s22] sm:$0xf]  ;;  %v456_v45 = vsub.f32 %v1499_v12, %v440_v36  ;;  %v459_v12 = vsub.f32 %v1515_v17, %v443_v5  ;;  %s1217_s22 = scalar_lea.vmem %s1687_s18, 128 }
 0x150   : > { %vm602_vm12 = vmand %vm592_vm10, %vm599_vm9  ;;  %v463_v17 = vsub.f32 %v1541_v25, %v447_v52  ;;  %v474_v25 = vpack.c.bf16 %v465_v21, %v464_v20  ;;  %p1218_p12 = scmp.ne.s32.totalorder %s1687_s18, %s1217_s22  ;;  %p1225_p2 = scmp.lt.s32.totalorder %s1223_s10, %s1217_s22 }
 0x151   : > { %vm1594_vm13 = vmand %vm593_vm11, %vm599_vm9  ;;  %v1024_v2 = vsel %vm602_vm12, 1.0, %v1329_v0  ;;  %v470_v6 = vpack.c.bf16 %v457_v46, %v456_v45  ;;  %v471_v53 = vpack.c.bf16 %v459_v12, %v458_v49 }
 0x152   : > { %vm1601_vm14 = vmpackc.low %vm1594_vm13, %vm602_vm12  ;;  %701 = vadd.xlane.f32.xlu1 %v1024_v2  ;;  %v1025_v44 = vsel %vm1594_vm13, 1.0, %v1329_v0  ;;  %v473_v59 = vpack.c.bf16 %v463_v17, %v462_v16  ;;  %p1219_p13 = pnand %p1218_p12, %p1417_p4  ;;  %p1226_p3 = por %p1225_p2, %p1224_p1 }
 0x153   : > { %1099 = vmatpush3.bf16.msk.msra.mxu0 %vm1601_vm14, %v1332_v38  ;;  %1105 = vmatpush3.bf16.msk.msra.mxu1 %vm1601_vm14, %v1332_v38 }
 0x154   : > { %1110 = vmatprep.subr.bf16.mxu1 %v1329_v0  ;;  %p1220_p0 = pneg %p1219_p13 }
 0x156   : > { %1107 = vmatmul.mubr.msk.bf16.vlgmr.msra.gmra.mrb[0].mxu1 %vm611_vm15, %v609_v39  ;;  %1101 = vmatmul.mubr.msk.bf16.vlgmr.msra.gmra.mrb[4].mxu0 %vm611_vm15, %v610_v40  ;;  %p1227_p5 = pnand %p1226_p3, %p1220_p0 }
 0x157   : > { %703 = vadd.xlane.f32.xlu1 %v1025_v44  ;;  %1111 = vmatpush3.bf16.msra.mxu1 %v468_v41 }
 0x158   : > { %1112 = vmatprep.subr.bf16.mxu1 %v1329_v0  ;;  %1126 = vmatprep.mubr.msk.bf16.mxu1 %vm1330_vm1, %v1329_v0 }
 0x15b   : > { %1113 = vmatpush3.bf16.msra.mxu1 %v469_v47 }
 0x15c   : > { %1114 = vmatprep.subr.bf16.mxu1 %v1329_v0 }
 0x15f   : > { %1115 = vmatpush3.bf16.msra.mxu1 %v470_v6 }
 0x160   : > { %1116 = vmatprep.subr.bf16.mxu1 %v1329_v0 }
 0x163   : > { %1117 = vmatpush3.bf16.msra.mxu1 %v471_v53 }
 0x164   : > { %1118 = vmatprep.subr.bf16.mxu1 %v1329_v0 }
 0x167   : > { %1119 = vmatpush3.bf16.msra.mxu1 %v472_v56 }
 0x168   : > { %1120 = vmatprep.subr.bf16.mxu1 %v1329_v0 }
 0x16b   : > { %1121 = vmatpush3.bf16.msra.mxu1 %v473_v59 }
 0x16c   : > { %1122 = vmatprep.subr.bf16.mxu1 %v1329_v0 }
 0x16f   : > { %1123 = vmatpush3.bf16.msra.mxu1 %v474_v25 }
 0x170   : > { %1124 = vmatprep.subr.bf16.mxu1 %v1329_v0 }
 0x173   : > { %1125 = vmatpush3.bf16.msra.mxu1 %v475_v63 }
 0x174   : > { %1130 = vmatprep.subr.bf16.mxu1 %v1329_v0 }
 0x176   : > { %1127 = vmatmul.mubr.msk.bf16.vlgmr.msra.gmra.mrb[4].mxu1 %vm1601_vm14, %v1332_v38 }
 0x177   : > { %1131 = vmatpush3.bf16.msra.mxu1 %v1461_v4  ;;  %1146 = vmatprep.mubr.msk.bf16.mxu1 %vm1330_vm1, %v1329_v0  ;;  %v699_v4 = vld [vmem:[%s1467_s30] sm:$0xff] }
 0x178   : > { %1132 = vmatprep.subr.bf16.mxu1 %v1329_v0 }
 0x17b   : > { %1133 = vmatpush3.bf16.msra.mxu1 %v1494_v8 }
 0x17c   : > { %1134 = vmatprep.subr.bf16.mxu1 %v1329_v0 }
 0x17f   : > { %1135 = vmatpush3.bf16.msra.mxu1 %v1507_v14 }
 0x180   : > { %1136 = vmatprep.subr.bf16.mxu1 %v1329_v0 }
 0x183   : > { %1137 = vmatpush3.bf16.msra.mxu1 %v1520_v18  ;;  %v700_v18 = vld [vmem:[%s1467_s30 + $0x8] sm:$0xff] }
 0x184   : > { %1138 = vmatprep.subr.bf16.mxu1 %v1329_v0 }
 0x187   : > { %1139 = vmatpush3.bf16.msra.mxu1 %v1533_v22 }
 0x188   : > { %1140 = vmatprep.subr.bf16.mxu1 %v1329_v0 }
 0x18b   : > { %1141 = vmatpush3.bf16.msra.mxu1 %v1546_v26 }
 0x18c   : > { %1142 = vmatprep.subr.bf16.mxu1 %v1329_v0 }
 0x18f   : > { %1143 = vmatpush3.bf16.msra.mxu1 %v1559_v30 }
 0x190   : > { %1144 = vmatprep.subr.bf16.mxu1 %v1329_v0 }
 0x193   : > { %1145 = vmatpush3.bf16.msra.mxu1 %v1572_v34 }
 0x196   : > { %1147 = vmatmul.mubr.msk.bf16.vlgmr.msra.gmra.mrb[8].mxu1 %vm1601_vm14, %v1332_v38 }
 0x1df   : > { %v702_v8 = vpop.xlane.xlu1 %701 }
 0x1e0   : > { %v705_v14 = vadd.f32 %v702_v8, %v699_v4 }
 0x1e2   : > { %708 = vst.msk [vmem:[%s1467_s30] sm:$0xff] %vm402_vm2, %v705_v14 }
 0x1e4   : > { %v704_v22 = vpop.xlane.xlu1 %703 }
 0x1e5   : > { %v706_v26 = vadd.f32 %v704_v22, %v700_v18 }
 0x1e7   : > { %709 = vst.msk [vmem:[%s1467_s30 + $0x8] sm:$0xff] %vm402_vm2, %v706_v26  ;;  %s799_s30 = scalar_lea.sflag [#allocation3], %s352_s15 }
 0x229   : > { %v692_v0 = vpop.f32.mrb[0].mxu1  ;;  %v649_v28 = vpop.f32.mrb[4].mxu0 }
 0x22a   : > { %v693_v29 = vadd.f32 %v692_v0, %v649_v28  ;;  %v1108_v30 = vpop.f32.mrb[1].mxu1  ;;  %v1102_v32 = vpop.f32.mrb[5].mxu0 }
 0x22b   : > { %v695_v33 = vpop.f32.mrb[2].mxu1  ;;  %v652_v34 = vpop.f32.mrb[6].mxu0 }
 0x22c   : > { %698 = vst [vmem:[%s354_s17] sm:$0xff] %v693_v29  ;;  %v1109_v1 = vpop.f32.mrb[3].mxu1  ;;  %v1103_v7 = vpop.f32.mrb[7].mxu0 }
 0x22d   : > { %1230 = shalt.err (!%p1227_p5)
}
 0x22e   : > { %s1231_s15 = scalar_lea.hbm %s1685_s21, 128  ;;  %s1235_s17 = scalar_lea.hbm %s1773_s5, 512 }
 0x22f   : > { %p1232_p6 = scmp.ne.s32.totalorder %s1685_s21, %s1231_s15  ;;  %p1236_p10 = scmp.lt.u32.totalorder %s1685_s21, %s1773_s5 }
 0x230   : > { %p1237_p11 = scmp.lt.u32.totalorder %s1235_s17, %s1231_s15  ;;  %p1239_p13 = scmp.lt.u32.totalorder %s1231_s15, %s1685_s21 }
 0x231   : > { %p1233_p7 = pnand %p1232_p6, %p1417_p4 }
 0x232   : > { %p1238_p12 = por %p1237_p11, %p1236_p10 }
 0x233   : > { %p1234_p9 = pneg %p1233_p7 }
 0x234   : > { %p1240_p0 = por %p1239_p13, %p1238_p12 }
 0x236   : > { %p1241_p1 = pnand %p1240_p0, %p1234_p9 }
 0x238   : > { %1244 = shalt.err (!%p1241_p1)
}
 0x239   : > { %1151 = dma.vmem_to_hbm [thread:$0]  (%p1417_p4), %s1687_s18, 128, %s1685_s21, %s799_s30   ;;  %v710_v19 = vld [vmem:[#allocation4] sm:$0xff]  ;;  %v711_v35 = vld [vmem:[#allocation4 + $0x8] sm:$0xff] }
 0x23a   : > { %s1046_s22 = sshll.u32 %s1319_s27, 8  ;;  %s1334_s23 = smov [#allocation4]  }
 0x23b   : > { %s834_s8 = sshll.u32 %s1334_s23, 4  ;;  %s1714_s18 = scalar_lea.hbm %s1775_s7, %s1046_s22  ;;  %s1716_s8 = int_to_ptr.vmem [resolvable:$true] %s834_s8 }
 0x23c   : > { %s1245_s27 = scalar_lea.vmem %s1716_s8, 256  ;;  %p1252_p6 = scmp.lt.s32.totalorder %s1716_s8, %s1716_s8 }
 0x23d   : > { %p1246_p2 = scmp.ne.s32.totalorder %s1716_s8, %s1245_s27  ;;  %p1253_p7 = scmp.lt.s32.totalorder %s1245_s27, %s1245_s27 }
 0x23f   : > { %p1247_p3 = pnand %p1246_p2, %p1417_p4  ;;  %p1254_p9 = por %p1253_p7, %p1252_p6 }
 0x241   : > { %p1248_p5 = pneg %p1247_p3 }
 0x243   : > { %p1255_p10 = pnand %p1254_p9, %p1248_p5 }
 0x249   : > { %v746_v9 = vpop.f32.mrb[4].mxu1 }
 0x24a   : > { %v1128_v10 = vpop.f32.mrb[5].mxu1 }
 0x24b   : > { %v749_v11 = vpop.f32.mrb[6].mxu1 }
 0x24c   : > { %v1129_v15 = vpop.f32.mrb[7].mxu1 }
 0x269   : > { %v787_v23 = vpop.f32.mrb[8].mxu1 }
 0x26a   : > { %v788_v27 = vadd.f32 %v787_v23, %v746_v9  ;;  %v1148_v31 = vpop.f32.mrb[9].mxu1 }
 0x26b   : > { %v790_v2 = vpop.f32.mrb[10].mxu1 }
 0x26c   : > { %v794_v3 = vadd.f32 %v788_v27, %v710_v19  ;;  %v791_v36 = vadd.f32 %v790_v2, %v749_v11  ;;  %v1149_v37 = vpop.f32.mrb[11].mxu1 }
 0x26e   : > { %796 = vst.msk [vmem:[#allocation4] sm:$0xff] %vm405_vm0, %v794_v3  ;;  %v795_v38 = vadd.f32 %v791_v36, %v711_v35 }
 0x270   : > { %797 = vst.msk [vmem:[#allocation4 + $0x8] sm:$0xff] %vm405_vm0, %v795_v38 }
 0x271   : > { %1258 = shalt.err (!%p1255_p10)
}
 0x272   : > { %s1259_s21 = scalar_lea.hbm %s1714_s18, 256  ;;  %s1263_s16 = scalar_lea.hbm %s1775_s7, 1024 }
 0x273   : > { %p1260_p11 = scmp.ne.s32.totalorder %s1714_s18, %s1259_s21  ;;  %p1264_p0 = scmp.lt.u32.totalorder %s1714_s18, %s1775_s7 }
 0x274   : > { %p1265_p1 = scmp.lt.u32.totalorder %s1263_s16, %s1259_s21  ;;  %p1267_p3 = scmp.lt.u32.totalorder %s1259_s21, %s1714_s18 }
 0x275   : > { %p1261_p12 = pnand %p1260_p11, %p1417_p4 }
 0x276   : > { %p1266_p2 = por %p1265_p1, %p1264_p0 }
 0x277   : > { %p1262_p13 = pneg %p1261_p12 }
 0x278   : > { %p1268_p5 = por %p1267_p3, %p1266_p2 }
 0x27a   : > { %p1269_p6 = pnand %p1268_p5, %p1262_p13 }
 0x27c   : > { %1272 = shalt.err (!%p1269_p6)
}
 0x27d   : > { %s1335_s20 = smov 128   ;;  %s1336_s22 = smov 8  }
 0x27e   : > { %1152 = dma.vmem_to_hbm [thread:$0]  (%p1417_p4), %s1716_s8, 256, %s1714_s18, [#allocation5], %s1335_s20, %s1335_s20, %s1336_s22  }
 0x27f   : > { %1298 = dma.done.wait (%p1417_p4), [#allocation5], 256  }
 0x280   : > { %1300 = vsyncadd (%p1417_p4), [#allocation5], 4294967040 }
 0x281 PF: > { %p1159_p7 = scmp.ge.s32.totalorder %s1327_s29, 2  ;;  %s861_s23 = sand.u32 1, %s1307_s24  }
 0x282   : > { %s862_s10 = scalar_lea.sflag [#allocation3], %s861_s23 }
 0x283   : > { %p1156_p9 = pnand %p1159_p7, %p1424_p8 }
 0x285   : > { %1302 = dma.done.wait (!%p1156_p9), %s862_s10, 128  }
 0x286   : > { %1304 = vsyncadd (!%p1156_p9), %s862_s10, 4294967168  ;;  %s22_s29 = sadd.s32 1, %s1327_s29   ;;  %s1782_s24 = smov %s1311_s25 }
 0x287   : > { %p19_p10 = scmp.ge.s32.totalorder %s22_s29, 6   ;;  %s1783_s25 = smov %s1315_s26 }
 0x288   : > { %s1784_s26 = smov %s1430_s14  ;;  %s1785_s27 = smov %s1323_s28 }
 0x289   : > { %s1786_s28 = smov %s1788_s9  ;;  %21 = sbr.rel (!%p19_p10) target bundleno = 5 (0x5), region = 112 }
 0x290   :  { %867 = vsyncpa [#allocation3], 1 }
 0x291   :  { %869 = vsyncpa [#allocation3 + $0x1], 1 }
 0x292   :  { %870 = vsyncpa [#allocation5], 1 }

// kernel: tpu_custom_call.1
= control target key start
LH: loop header
LB: loop body
LE: loop exit
PB: predicated region body
PF: predicated region fallthrough
CT: control target
= control target key end

     0   :  { %13 = vsyncpa [#allocation3], 0  ;;  %s1806_s0 = inlined_call_operand.vmem [shape: f32[4,128,32], index: 0, kind: input, shape index: {}]   ;;  %s1807_s1 = inlined_call_operand.vmem [shape: bf16[4,16,32], index: 1, kind: input, shape index: {}]   ;;  %s1808_s2 = inlined_call_operand.vmem [shape: bf16[4,8,16], index: 2, kind: input, shape index: {}]   ;;  %s1809_s3 = inlined_call_operand.vmem [shape: bf16[4,8,16], index: 3, kind: input, shape index: {}]   ;;  %s1810_s4 = inlined_call_operand.vmem [shape: f32[4,16,1], index: 4, kind: input, shape index: {}]   ;;  %s1811_s5 = inlined_call_operand.hbm [shape: f32[4,8,128], index: 5, kind: output, shape index: {0}]   ;;  %s1812_s6 = inlined_call_operand.vmem [shape: f32[4,16,1], index: 6, kind: output, shape index: {1}]   ;;  %s1813_s7 = inlined_call_operand.hbm [shape: f32[4,16,32], index: 7, kind: output, shape index: {2}]  }
   0x1   :  { %15 = vsyncpa [#allocation3 + $0x1], 0 }
   0x2   :  { %16 = vsyncpa [#allocation5], 0 }
   0x3   :  { %18 = vsyncpa [#allocation5 + $0x1], 0  ;;  %s1403_s24 = smov 0   ;;  %s1405_s25 = smov 0  }
   0x4   :  { %s1407_s26 = smov 0   ;;  %s1409_s27 = smov 0  }
   0x5   :  { %s1411_s28 = smov 0   ;;  %s1413_s29 = smov 0  }
   0x6 LB: > { %s1028_s30 = sadd.s32 4294967295, %s1353_s29   ;;  %s1029_s8 = sadd.s32 4294967294, %s1353_s29   ;;  %s1353_s29 = sphi %s1413_s29, %s24_s29   ;;  %s1349_s28 = sphi %s1411_s28, %s1824_s28   ;;  %s1345_s27 = sphi %s1409_s27, %s1823_s27   ;;  %s1341_s26 = sphi %s1407_s26, %s1822_s26   ;;  %s1337_s25 = sphi %s1405_s25, %s1821_s25   ;;  %s1333_s24 = sphi %s1403_s24, %s1820_s24  }
   0x7   : > { %s36_s9 = sadd.s32 1, %s1349_s28  ;;  %s177_s10 = sadd.s32 1, %s1341_s26 }
   0x8   : > { %p38_p0 = scmp.ge.s32.totalorder %s36_s9, 4  ;;  %p187_p1 = scmp.ne.s32.totalorder %s1341_s26, %s1337_s25 }
   0x9   : > { %p188_p2 = scmp.eq.s32.totalorder %s1028_s30, 3  ;;  %p193_p3 = scmp.ne.s32.totalorder %s1337_s25, %s1333_s24 }
   0xa   : > { %s1826_s9 = smov (%p38_p0, %s36_s9), 0  ;;  %p194_p5 = scmp.eq.s32.totalorder %s1029_s8, 3 }
   0xb   : > { %p1443_p4 = por %p188_p2, %p187_p1  ;;  %s172_s12 = ssub.s32 %s1349_s28, %s1826_s9 }
   0xc   : > { %p1032_p6 = scmp.ge.s32.totalorder %s1353_s29, 1  ;;  %p175_p7 = scmp.eq.s32.totalorder %s172_s12, 0 }
   0xd   : > { %p1450_p8 = por %p194_p5, %p193_p3  ;;  %p307_p9 = scmp.lt.s32.totalorder %s1353_s29, 5 }
   0xe   : > { %s1456_s14 = scalar_select %p175_p7, %s1341_s26, %s177_s10  }
   0xf   : > { %p308_p10 = pnand %p1032_p6, %p307_p9 }
  0x10   : > { %p372_p11 = scmp.lt.s32.totalorder (!%p308_p10), %s1345_s27, 3  ;;  %v1355_v0 = vmov (!%p308_p10), 0.0   ;;  %vm1356_vm0 = vmmov (!%p308_p10), 0   ;;  %v1357_v1 = vmov (!%p308_p10), 0   ;;  %vm409_vm1 = vcmask (!%p308_p10), 7168  }
  0x11   : > { %311 = sbr.rel (%p308_p10) target bundleno = 640 (0x280), region = 40  ;;  %1102 = vmatprep.subr.bf16.mxu0 (!%p308_p10), %v1355_v0  ;;  %1118 = vmatprep.mubr.msk.bf16.mxu0 (!%p308_p10), %vm1356_vm0, %v1355_v0  ;;  %vm412_vm2 = vcmask (!%p308_p10), 261120   ;;  %v569_v37 = vlaneseq (!%p308_p10)  ;;  %vm618_vm15 = vcmask (!%p308_p10), 130048  }
  0x12   : > { %1241 = vset.pattern.permute.xlu0 (!%p308_p10), %v1357_v1  ;;  %1128 = vmatprep.subr.bf16.mxu1 (!%p308_p10), %v1355_v0 }
  0x13   : > { %1130 = vmatprep.mubr.msk.bf16.mxu1 (!%p308_p10), %vm1356_vm0, %v1355_v0  ;;  %v570_v39 = vshrl.u32 (!%p308_p10), %v569_v37, 7  ;;  %v603_v1 = vand.u32 (!%p308_p10), 127, %v569_v37 }
  0x15   : > { %v571_v45 = vadd.s32 (!%p308_p10), 8, %v570_v39  ;;  %v580_v51 = vsub.s32 (!%p308_p10), 15, %v570_v39  ;;  %vm606_vm9 = vcmp.lt.s32.totalorder (!%p308_p10), %v603_v1, 16 }
  0x17   : > { %v581_v53 = vsub.s32 (!%p308_p10), 15, %v571_v45 }
  0x18   : > { %s1463_s15 = scalar_select %p372_p11, %s1345_s27, 3 }
  0x1a   : > { %s1066_s16 = sshll.u32 %s1463_s15, 7  ;;  %s1068_s20 = sshll.u32 %s1463_s15, 4 }
  0x1b   : > { %s1472_s19 = scalar_lea.vmem %s1806_s0, %s1066_s16  ;;  %s1067_s21 = sshll.u32 %s1463_s15, 3 }
  0x1c   : > { %v1475_v2 = vld [vmem:[%s1472_s19] sm:$0xff]  ;;  %v1478_v3 = vld [vmem:[%s1472_s19 + $0x8] sm:$0xff]  ;;  %s1489_s30 = scalar_lea.vmem %s1812_s6, %s1068_s20  ;;  %v1492_v5 = vld [vmem:[%s1472_s19 + $0x10] sm:$0xff]  ;;  %s398_s12 = scalar_lea.vmem %s1810_s4, %s1068_s20 }
  0x1d   : > { %v1483_v4 = vpack.c.bf16 %v1478_v3, %v1475_v2  ;;  %v1495_v6 = vld [vmem:[%s1472_s19 + $0x18] sm:$0xff]  ;;  %410 = vst.msk [vmem:[%s1489_s30] sm:$0xff] %vm409_vm1, %v1355_v0  ;;  %411 = vst.msk [vmem:[%s1489_s30 + $0x8] sm:$0xff] %vm409_vm1, %v1355_v0  ;;  %s1511_s18 = scalar_lea.vmem %s1807_s1, %s1067_s21  ;;  %v433_v9 = vld [vmem:[%s398_s12] sm:$0xff] }
  0x1e   : > { %v1516_v8 = vpack.c.bf16 %v1495_v6, %v1492_v5  ;;  %559 = vperm.xlu0 %1241, %v433_v9   ;;  %v434_v10 = vld [vmem:[%s398_s12 + $0x8] sm:$0xff]  ;;  %v1521_v12 = vld [vmem:[%s1472_s19 + $0x20] sm:$0xff]  ;;  %v1534_v16 = vld [vmem:[%s1472_s19 + $0x30] sm:$0xff] }
  0x1f   : > { %v493_v7 = vsel %vm412_vm2, %v1483_v4, 0  ;;  %v1524_v13 = vld [vmem:[%s1472_s19 + $0x28] sm:$0xff]  ;;  %v1537_v17 = vld [vmem:[%s1472_s19 + $0x38] sm:$0xff]  ;;  %v1547_v20 = vld [vmem:[%s1472_s19 + $0x40] sm:$0xff]  ;;  %v443_v9 = vunpack.c.l.bf16 %v1483_v4 }
  0x20   : > { %1103 = vmatpush3.bf16.xpose.msra.mxu0 %v493_v7  ;;  %v496_v11 = vsel %vm412_vm2, %v1516_v8, 0  ;;  %v1529_v14 = vpack.c.bf16 %v1524_v13, %v1521_v12  ;;  %v1542_v18 = vpack.c.bf16 %v1537_v17, %v1534_v16  ;;  %v1550_v21 = vld [vmem:[%s1472_s19 + $0x48] sm:$0xff]  ;;  %v1560_v24 = vld [vmem:[%s1472_s19 + $0x50] sm:$0xff]  ;;  %v1563_v25 = vld [vmem:[%s1472_s19 + $0x58] sm:$0xff] }
  0x21   : > { %1104 = vmatprep.subr.bf16.mxu0 %v1355_v0  ;;  %v1555_v22 = vpack.c.bf16 %v1550_v21, %v1547_v20  ;;  %v1568_v26 = vpack.c.bf16 %v1563_v25, %v1560_v24  ;;  %v1573_v28 = vld [vmem:[%s1472_s19 + $0x60] sm:$0xff]  ;;  %v1576_v29 = vld [vmem:[%s1472_s19 + $0x68] sm:$0xff]  ;;  %v1586_v32 = vld [vmem:[%s1472_s19 + $0x70] sm:$0xff] }
  0x22   : > { %564 = vperm.xlu0 %1241, %v434_v10   ;;  %v499_v15 = vsel %vm412_vm2, %v1529_v14, 0  ;;  %v502_v19 = vsel %vm412_vm2, %v1542_v18, 0  ;;  %v1581_v30 = vpack.c.bf16 %v1576_v29, %v1573_v28  ;;  %v1589_v33 = vld [vmem:[%s1472_s19 + $0x78] sm:$0xff]  ;;  %v1242_v36 = vld [vmem:[%s1511_s18] sm:$0xff]   ;;  %v444_v10 = vunpack.c.h.bf16 %v1483_v4  ;;  %s1039_s19 = sshll.u32 %s1463_s15, 2  ;;  %s1697_s15 = sand.u32 1, %s1337_s25  }
  0x23   : > { %v505_v23 = vsel %vm412_vm2, %v1555_v22, 0  ;;  %v508_v27 = vsel %vm412_vm2, %v1568_v26, 0  ;;  %v1594_v34 = vpack.c.bf16 %v1589_v33, %v1586_v32  ;;  %s389_s22 = scalar_lea.vmem %s1808_s2, %s1039_s19  ;;  %s393_s10 = scalar_lea.vmem %s1809_s3, %s1039_s19  ;;  %v448_v37 = vunpack.c.h.bf16 %v1529_v14 }
  0x24   : > { %v511_v31 = vsel %vm412_vm2, %v1581_v30, 0  ;;  %s1034_s12 = sshll.u32 %s1697_s15, 4  ;;  %s1033_s17 = sshll.u32 %s1697_s15, 3 }
  0x25   : > { %v514_v35 = vsel %vm412_vm2, %v1594_v34, 0  ;;  %s1700_s16 = scalar_lea.vmem [#allocation4], %s1034_s12  ;;  %s1061_s18 = sshll.u32 %s1345_s27, 7 }
  0x26   : > { %413 = vst.msk [vmem:[%s1700_s16] sm:$0xff] %vm412_vm2, %v1355_v0  ;;  %414 = vst.msk [vmem:[%s1700_s16 + $0x8] sm:$0xff] %vm412_vm2, %v1355_v0  ;;  %s356_s19 = scalar_lea.vmem [#allocation2], %s1033_s17  ;;  %s1719_s23 = scalar_lea.hbm %s1811_s5, %s1061_s18 }
  0x27   : > { %s830_s20 = sshll.u32 %s356_s19, 4  ;;  %s1721_s20 = int_to_ptr.vmem [resolvable:$true] %s830_s20 }
  0x28   : > { %1105 = vmatpush3.bf16.xpose.msra.mxu0 %v496_v11  ;;  %s1243_s8 = scalar_lea.vmem %s1721_s20, 128 }
  0x29   : > { %1106 = vmatprep.subr.bf16.mxu0 %v1355_v0  ;;  %p1244_p12 = scmp.ne.s32.totalorder %s1721_s20, %s1243_s8 }
  0x2b   : > { %p1245_p13 = pnand %p1244_p12, %p1443_p4 }
  0x2d   : > { %p1246_p0 = pneg %p1245_p13 }
  0x30   : > { %1107 = vmatpush3.bf16.xpose.msra.mxu0 %v499_v15 }
  0x31   : > { %1108 = vmatprep.subr.bf16.mxu0 %v1355_v0 }
  0x38   : > { %1109 = vmatpush3.bf16.xpose.msra.mxu0 %v502_v19  ;;  %v459_v19 = vsub.f32 %v1475_v2, %v443_v9 }
  0x39   : > { %1110 = vmatprep.subr.bf16.mxu0 %v1355_v0 }
  0x40   : > { %1111 = vmatpush3.bf16.xpose.msra.mxu0 %v505_v23  ;;  %v460_v23 = vsub.f32 %v1478_v3, %v444_v10 }
  0x41   : > { %1112 = vmatprep.subr.bf16.mxu0 %v1355_v0 }
  0x48   : > { %1113 = vmatpush3.bf16.xpose.msra.mxu0 %v508_v27  ;;  %v445_v27 = vunpack.c.l.bf16 %v1516_v8 }
  0x49   : > { %1114 = vmatprep.subr.bf16.mxu0 %v1355_v0 }
  0x50   : > { %1115 = vmatpush3.bf16.xpose.msra.mxu0 %v511_v31  ;;  %v446_v31 = vunpack.c.h.bf16 %v1516_v8 }
  0x51   : > { %1116 = vmatprep.subr.bf16.mxu0 %v1355_v0 }
  0x58   : > { %1117 = vmatpush3.bf16.xpose.msra.mxu0 %v514_v35 }
  0x59   : > { %1122 = vmatprep.subr.bf16.mxu0 %v1355_v0 }
  0x5f   : > { %1119 = vmatmul.mubr.msk.bf16.vlgmr.msra.gmra.mrb[0].mxu0 %vm412_vm2, %v1242_v36  ;;  %v447_v36 = vunpack.c.l.bf16 %v1529_v14 }
  0x60   : > { %1124 = vmatprep.mubr.msk.bf16.mxu0 %vm1356_vm0, %v1355_v0 }
  0x9d   : > { %v560_v38 = vpop.permute.xlu0 %559 }
  0xa1   : > { %v565_v43 = vpop.permute.xlu0 %564 }
 0x132   : > { %v550_v40 = vpop.f32.mrb[0].mxu0 }
 0x133   : > { %v567_v41 = vsub.f32 %v550_v40, %v560_v38  ;;  %v1120_v42 = vpop.f32.mrb[1].mxu0  ;;  %v1358_v38 = vmov 1.0|1.0   ;;  %v617_v40 = vld [vmem:[%s393_s10] sm:$0xf]  ;;  %s1359_s10 = smov [#allocation2]  }
 0x134   : > { %v553_v44 = vpop.f32.mrb[2].mxu0  ;;  %v461_v42 = vsub.f32 %v1492_v5, %v445_v27  ;;  %v450_v5 = vunpack.c.h.bf16 %v1542_v18  ;;  %s1247_s12 = sshll.u32 %s1359_s10, 4  ;;  %s1248_s12 = int_to_ptr.vmem [resolvable:$false] %s1247_s12 }
 0x135   : > { %vm574_vm3 = vcmp.lt.s32.totalorder %v567_v41, 0  ;;  %v576_v46 = vxor.u32 2147483647, %v567_v41  ;;  %v568_v47 = vsub.f32 %v553_v44, %v565_v43  ;;  %v1121_v48 = vpop.f32.mrb[3].mxu0  ;;  %v462_v43 = vsub.f32 %v1495_v6, %v446_v31  ;;  %s1249_s17 = scalar_lea.vmem %s1248_s12, 256  ;;  %p1250_p1 = scmp.lt.s32.totalorder %s1721_s20, %s1248_s12 }
 0x136   : > { %v449_v48 = vunpack.c.l.bf16 %v1542_v18  ;;  %p1251_p2 = scmp.lt.s32.totalorder %s1249_s17, %s1243_s8 }
 0x137   : > { %v578_v49 = vsel %vm574_vm3, %v576_v46, %v567_v41  ;;  %vm575_vm4 = vcmp.lt.s32.totalorder %v568_v47, 0  ;;  %v577_v50 = vxor.u32 2147483647, %v568_v47  ;;  %v475_v41 = vpack.c.bf16 %v460_v23, %v459_v19 }
 0x138   : > { %v582_v52 = vand.u32 4294967280, %v578_v49  ;;  %v464_v46 = vsub.f32 %v1524_v13, %v448_v37  ;;  %v465_v49 = vsub.f32 %v1534_v16, %v449_v48  ;;  %v451_v13 = vunpack.c.l.bf16 %v1555_v22  ;;  %p1252_p3 = por %p1251_p2, %p1250_p1 }
 0x139   : > { %v579_v54 = vsel %vm575_vm4, %v577_v50, %v568_v47  ;;  %v476_v47 = vpack.c.bf16 %v462_v43, %v461_v42  ;;  %v452_v50 = vunpack.c.h.bf16 %v1555_v22 }
 0x13a   : > { %v583_v55 = vand.u32 4294967280, %v579_v54  ;;  %v584_v56 = vor.u32 %v582_v52, %v580_v51  ;;  %v453_v51 = vunpack.c.l.bf16 %v1568_v26  ;;  %v454_v52 = vunpack.c.h.bf16 %v1568_v26  ;;  %p1253_p5 = pnand %p1252_p3, %p1246_p0 }
 0x13b   : > { %v467_v54 = vsub.f32 %v1547_v20, %v451_v13 }
 0x13c   : > { %v585_v57 = vor.u32 %v583_v55, %v581_v53  ;;  %v468_v55 = vsub.f32 %v1550_v21, %v452_v50  ;;  %v469_v16 = vsub.f32 %v1560_v24, %v453_v51  ;;  %v458_v24 = vunpack.c.h.bf16 %v1594_v34 }
 0x13e   : > { %vm586_vm5 = vcmp.gt.s32.totalorder %v584_v56, %v585_v57 }
 0x13f   : > { %v587_v58 = vsel %vm586_vm5, %v584_v56, %v585_v57  ;;  %v479_v56 = vpack.c.bf16 %v468_v55, %v467_v54  ;;  %v455_v57 = vunpack.c.l.bf16 %v1581_v30 }
 0x140   : > { %v588_v59 = vrot.slane %v587_v58, 4 }
 0x141   : > { %v471_v20 = vsub.f32 %v1573_v28, %v455_v57 }
 0x142   : > { %vm589_vm6 = vcmp.gt.s32.totalorder %v587_v58, %v588_v59 }
 0x143   : > { %v590_v60 = vsel %vm589_vm6, %v587_v58, %v588_v59  ;;  %v456_v58 = vunpack.c.h.bf16 %v1581_v30 }
 0x144   : > { %v591_v61 = vrot.slane %v590_v60, 2 }
 0x145   : > { %v472_v21 = vsub.f32 %v1576_v29, %v456_v58 }
 0x146   : > { %vm592_vm7 = vcmp.gt.s32.totalorder %v590_v60, %v591_v61 }
 0x147   : > { %v593_v62 = vsel %vm592_vm7, %v590_v60, %v591_v61  ;;  %v457_v60 = vunpack.c.l.bf16 %v1594_v34 }
 0x148   : > { %v594_v63 = vrot.slane %v593_v62, 1 }
 0x149   : > { %v473_v61 = vsub.f32 %v1586_v32, %v457_v60 }
 0x14a   : > { %vm595_vm8 = vcmp.gt.s32.totalorder %v593_v62, %v594_v63 }
 0x14b   : > { %v596_v7 = vsel %vm595_vm8, %v593_v62, %v594_v63  ;;  %v474_v62 = vsub.f32 %v1589_v33, %v458_v24 }
 0x14c   : > { %v597_v11 = vand.u32 15, %v596_v7 }
 0x14d   : > { %v482_v63 = vpack.c.bf16 %v474_v62, %v473_v61 }
 0x14e   : > { %v598_v15 = vsub.s32 15, %v597_v11 }
 0x150   : > { %vm599_vm10 = vcmp.eq.s32.totalorder %v570_v39, %v598_v15  ;;  %vm600_vm11 = vcmp.eq.s32.totalorder %v571_v45, %v598_v15  ;;  %v616_v39 = vld [vmem:[%s389_s22] sm:$0xf]  ;;  %v463_v45 = vsub.f32 %v1521_v12, %v447_v36  ;;  %v466_v12 = vsub.f32 %v1537_v17, %v450_v5 }
 0x151   : > { %vm609_vm12 = vmand %vm599_vm10, %vm606_vm9  ;;  %v470_v17 = vsub.f32 %v1563_v25, %v454_v52  ;;  %v481_v25 = vpack.c.bf16 %v472_v21, %v471_v20 }
 0x152   : > { %vm1616_vm13 = vmand %vm600_vm11, %vm606_vm9  ;;  %v1047_v2 = vsel %vm609_vm12, 1.0, %v1355_v0  ;;  %v477_v6 = vpack.c.bf16 %v464_v46, %v463_v45  ;;  %v478_v53 = vpack.c.bf16 %v466_v12, %v465_v49 }
 0x153   : > { %vm1623_vm14 = vmpackc.low %vm1616_vm13, %vm609_vm12  ;;  %708 = vadd.xlane.f32.xlu1 %v1047_v2  ;;  %v1048_v44 = vsel %vm1616_vm13, 1.0, %v1355_v0  ;;  %v480_v59 = vpack.c.bf16 %v470_v17, %v469_v16 }
 0x154   : > { %1123 = vmatpush3.bf16.msk.msra.mxu0 %vm1623_vm14, %v1358_v38  ;;  %1129 = vmatpush3.bf16.msk.msra.mxu1 %vm1623_vm14, %v1358_v38 }
 0x155   : > { %1134 = vmatprep.subr.bf16.mxu1 %v1355_v0 }
 0x157   : > { %1131 = vmatmul.mubr.msk.bf16.vlgmr.msra.gmra.mrb[0].mxu1 %vm618_vm15, %v616_v39  ;;  %1125 = vmatmul.mubr.msk.bf16.vlgmr.msra.gmra.mrb[4].mxu0 %vm618_vm15, %v617_v40 }
 0x158   : > { %710 = vadd.xlane.f32.xlu1 %v1048_v44  ;;  %1135 = vmatpush3.bf16.msra.mxu1 %v475_v41 }
 0x159   : > { %1136 = vmatprep.subr.bf16.mxu1 %v1355_v0  ;;  %1150 = vmatprep.mubr.msk.bf16.mxu1 %vm1356_vm0, %v1355_v0 }
 0x15c   : > { %1137 = vmatpush3.bf16.msra.mxu1 %v476_v47 }
 0x15d   : > { %1138 = vmatprep.subr.bf16.mxu1 %v1355_v0 }
 0x160   : > { %1139 = vmatpush3.bf16.msra.mxu1 %v477_v6 }
 0x161   : > { %1140 = vmatprep.subr.bf16.mxu1 %v1355_v0 }
 0x164   : > { %1141 = vmatpush3.bf16.msra.mxu1 %v478_v53 }
 0x165   : > { %1142 = vmatprep.subr.bf16.mxu1 %v1355_v0 }
 0x168   : > { %1143 = vmatpush3.bf16.msra.mxu1 %v479_v56 }
 0x169   : > { %1144 = vmatprep.subr.bf16.mxu1 %v1355_v0 }
 0x16c   : > { %1145 = vmatpush3.bf16.msra.mxu1 %v480_v59 }
 0x16d   : > { %1146 = vmatprep.subr.bf16.mxu1 %v1355_v0 }
 0x170   : > { %1147 = vmatpush3.bf16.msra.mxu1 %v481_v25 }
 0x171   : > { %1148 = vmatprep.subr.bf16.mxu1 %v1355_v0 }
 0x174   : > { %1149 = vmatpush3.bf16.msra.mxu1 %v482_v63 }
 0x175   : > { %1154 = vmatprep.subr.bf16.mxu1 %v1355_v0 }
 0x177   : > { %1151 = vmatmul.mubr.msk.bf16.vlgmr.msra.gmra.mrb[4].mxu1 %vm1623_vm14, %v1358_v38 }
 0x178   : > { %1155 = vmatpush3.bf16.msra.mxu1 %v1483_v4  ;;  %1170 = vmatprep.mubr.msk.bf16.mxu1 %vm1356_vm0, %v1355_v0  ;;  %v706_v4 = vld [vmem:[%s1489_s30] sm:$0xff] }
 0x179   : > { %1156 = vmatprep.subr.bf16.mxu1 %v1355_v0 }
 0x17c   : > { %1157 = vmatpush3.bf16.msra.mxu1 %v1516_v8 }
 0x17d   : > { %1158 = vmatprep.subr.bf16.mxu1 %v1355_v0 }
 0x180   : > { %1159 = vmatpush3.bf16.msra.mxu1 %v1529_v14 }
 0x181   : > { %1160 = vmatprep.subr.bf16.mxu1 %v1355_v0 }
 0x184   : > { %1161 = vmatpush3.bf16.msra.mxu1 %v1542_v18  ;;  %v707_v18 = vld [vmem:[%s1489_s30 + $0x8] sm:$0xff] }
 0x185   : > { %1162 = vmatprep.subr.bf16.mxu1 %v1355_v0 }
 0x188   : > { %1163 = vmatpush3.bf16.msra.mxu1 %v1555_v22 }
 0x189   : > { %1164 = vmatprep.subr.bf16.mxu1 %v1355_v0 }
 0x18c   : > { %1165 = vmatpush3.bf16.msra.mxu1 %v1568_v26 }
 0x18d   : > { %1166 = vmatprep.subr.bf16.mxu1 %v1355_v0 }
 0x190   : > { %1167 = vmatpush3.bf16.msra.mxu1 %v1581_v30 }
 0x191   : > { %1168 = vmatprep.subr.bf16.mxu1 %v1355_v0 }
 0x194   : > { %1169 = vmatpush3.bf16.msra.mxu1 %v1594_v34 }
 0x197   : > { %1171 = vmatmul.mubr.msk.bf16.vlgmr.msra.gmra.mrb[8].mxu1 %vm1623_vm14, %v1358_v38 }
 0x1e0   : > { %v709_v8 = vpop.xlane.xlu1 %708 }
 0x1e1   : > { %v712_v14 = vadd.f32 %v709_v8, %v706_v4 }
 0x1e3   : > { %715 = vst.msk [vmem:[%s1489_s30] sm:$0xff] %vm409_vm1, %v712_v14 }
 0x1e5   : > { %v711_v22 = vpop.xlane.xlu1 %710 }
 0x1e6   : > { %v713_v26 = vadd.f32 %v711_v22, %v707_v18 }
 0x1e8   : > { %716 = vst.msk [vmem:[%s1489_s30 + $0x8] sm:$0xff] %vm409_vm1, %v713_v26  ;;  %s806_s30 = scalar_lea.sflag [#allocation3], %s1697_s15 }
 0x22a   : > { %v699_v28 = vpop.f32.mrb[0].mxu1  ;;  %v656_v29 = vpop.f32.mrb[4].mxu0 }
 0x22b   : > { %v700_v30 = vadd.f32 %v699_v28, %v656_v29  ;;  %v1132_v0 = vpop.f32.mrb[1].mxu1  ;;  %v1126_v32 = vpop.f32.mrb[5].mxu0 }
 0x22c   : > { %v702_v33 = vpop.f32.mrb[2].mxu1  ;;  %v659_v34 = vpop.f32.mrb[6].mxu0 }
 0x22d   : > { %705 = vst [vmem:[%s356_s19] sm:$0xff] %v700_v30  ;;  %v1133_v1 = vpop.f32.mrb[3].mxu1  ;;  %v1127_v7 = vpop.f32.mrb[7].mxu0 }
 0x22e   : > { %1256 = shalt.err (!%p1253_p5)
}
 0x22f   : > { %s1257_s18 = scalar_lea.hbm %s1719_s23, 128  ;;  %s1261_s22 = scalar_lea.hbm %s1811_s5, 512 }
 0x230   : > { %p1258_p6 = scmp.ne.s32.totalorder %s1719_s23, %s1257_s18  ;;  %p1262_p10 = scmp.lt.u32.totalorder %s1719_s23, %s1811_s5 }
 0x231   : > { %p1263_p11 = scmp.lt.u32.totalorder %s1261_s22, %s1257_s18  ;;  %p1265_p13 = scmp.lt.u32.totalorder %s1257_s18, %s1719_s23 }
 0x232   : > { %p1259_p7 = pnand %p1258_p6, %p1443_p4 }
 0x233   : > { %p1264_p12 = por %p1263_p11, %p1262_p10 }
 0x234   : > { %p1260_p9 = pneg %p1259_p7 }
 0x235   : > { %p1266_p0 = por %p1265_p13, %p1264_p12 }
 0x237   : > { %p1267_p1 = pnand %p1266_p0, %p1260_p9 }
 0x239   : > { %1270 = shalt.err (!%p1267_p1)
}
 0x23a   : > { %1175 = dma.vmem_to_hbm [thread:$0]  (%p1443_p4), %s1721_s20, 128, %s1719_s23, %s806_s30   ;;  %v717_v19 = vld [vmem:[%s1700_s16] sm:$0xff]  ;;  %v718_v35 = vld [vmem:[%s1700_s16 + $0x8] sm:$0xff] }
 0x23b   : > { %s1070_s8 = sshll.u32 %s1345_s27, 8  ;;  %s846_s17 = sshll.u32 %s1700_s16, 4  ;;  %s1754_s17 = int_to_ptr.vmem [resolvable:$true] %s846_s17 }
 0x23c   : > { %s1752_s30 = scalar_lea.hbm %s1813_s7, %s1070_s8  ;;  %s816_s27 = scalar_lea.sflag [#allocation5], %s1697_s15 }
 0x23d   : > { %s1271_s18 = scalar_lea.vmem %s1754_s17, 256  ;;  %s1360_s19 = smov [#allocation4]  }
 0x23e   : > { %p1272_p2 = scmp.ne.s32.totalorder %s1754_s17, %s1271_s18  ;;  %s1275_s21 = sshll.u32 %s1360_s19, 4  ;;  %s1276_s21 = int_to_ptr.vmem [resolvable:$false] %s1275_s21 }
 0x23f   : > { %s1277_s22 = scalar_lea.vmem %s1276_s21, 512  ;;  %p1278_p6 = scmp.lt.s32.totalorder %s1754_s17, %s1276_s21 }
 0x240   : > { %p1273_p3 = pnand %p1272_p2, %p1443_p4  ;;  %p1279_p7 = scmp.lt.s32.totalorder %s1277_s22, %s1271_s18 }
 0x242   : > { %p1274_p5 = pneg %p1273_p3  ;;  %p1280_p9 = por %p1279_p7, %p1278_p6 }
 0x244   : > { %p1281_p10 = pnand %p1280_p9, %p1274_p5 }
 0x24a   : > { %v753_v9 = vpop.f32.mrb[4].mxu1 }
 0x24b   : > { %v1152_v10 = vpop.f32.mrb[5].mxu1 }
 0x24c   : > { %v756_v11 = vpop.f32.mrb[6].mxu1 }
 0x24d   : > { %v1153_v15 = vpop.f32.mrb[7].mxu1 }
 0x26a   : > { %v794_v23 = vpop.f32.mrb[8].mxu1 }
 0x26b   : > { %v795_v27 = vadd.f32 %v794_v23, %v753_v9  ;;  %v1172_v31 = vpop.f32.mrb[9].mxu1 }
 0x26c   : > { %v797_v2 = vpop.f32.mrb[10].mxu1 }
 0x26d   : > { %v801_v3 = vadd.f32 %v795_v27, %v717_v19  ;;  %v798_v36 = vadd.f32 %v797_v2, %v756_v11  ;;  %v1173_v37 = vpop.f32.mrb[11].mxu1 }
 0x26f   : > { %803 = vst.msk [vmem:[%s1700_s16] sm:$0xff] %vm412_vm2, %v801_v3  ;;  %v802_v38 = vadd.f32 %v798_v36, %v718_v35 }
 0x271   : > { %804 = vst.msk [vmem:[%s1700_s16 + $0x8] sm:$0xff] %vm412_vm2, %v802_v38 }
 0x272   : > { %1284 = shalt.err (!%p1281_p10)
}
 0x273   : > { %s1285_s16 = scalar_lea.hbm %s1752_s30, 256  ;;  %s1289_s8 = scalar_lea.hbm %s1813_s7, 1024 }
 0x274   : > { %p1286_p11 = scmp.ne.s32.totalorder %s1752_s30, %s1285_s16  ;;  %p1290_p0 = scmp.lt.u32.totalorder %s1752_s30, %s1813_s7 }
 0x275   : > { %p1291_p1 = scmp.lt.u32.totalorder %s1289_s8, %s1285_s16  ;;  %p1293_p3 = scmp.lt.u32.totalorder %s1285_s16, %s1752_s30 }
 0x276   : > { %p1287_p12 = pnand %p1286_p11, %p1443_p4 }
 0x277   : > { %p1292_p2 = por %p1291_p1, %p1290_p0 }
 0x278   : > { %p1288_p13 = pneg %p1287_p12 }
 0x279   : > { %p1294_p5 = por %p1293_p3, %p1292_p2 }
 0x27b   : > { %p1295_p6 = pnand %p1294_p5, %p1288_p13 }
 0x27d   : > { %1298 = shalt.err (!%p1295_p6)
}
 0x27e   : > { %s1361_s18 = smov 128   ;;  %s1362_s19 = smov 8  }
 0x27f   : > { %1176 = dma.vmem_to_hbm [thread:$0]  (%p1443_p4), %s1754_s17, 256, %s1752_s30, %s816_s27, %s1361_s18, %s1361_s18, %s1362_s19  }
 0x280 PF: > { %p1186_p7 = scmp.ge.s32.totalorder %s1353_s29, 2  ;;  %s861_s21 = sand.u32 1, %s1333_s24  }
 0x281   : > { %s862_s22 = scalar_lea.sflag [#allocation3], %s861_s21 }
 0x282   : > { %p1180_p9 = pnand %p1186_p7, %p1450_p8 }
 0x284   : > { %1324 = dma.done.wait (!%p1180_p9), %s862_s22, 128  }
 0x285   : > { %1326 = vsyncadd (!%p1180_p9), %s862_s22, 4294967168  ;;  %s879_s16 = scalar_lea.sflag [#allocation5], %s861_s21 }
 0x286   : > { %1328 = dma.done.wait (!%p1180_p9), %s879_s16, 256  }
 0x287   : > { %1330 = vsyncadd (!%p1180_p9), %s879_s16, 4294967040  ;;  %s24_s29 = sadd.s32 1, %s1353_s29   ;;  %s1820_s24 = smov %s1337_s25 }
 0x288   : > { %p21_p10 = scmp.ge.s32.totalorder %s24_s29, 6   ;;  %s1821_s25 = smov %s1341_s26 }
 0x289   : > { %s1822_s26 = smov %s1456_s14  ;;  %s1823_s27 = smov %s1349_s28 }
 0x28a   : > { %s1824_s28 = smov %s1826_s9  ;;  %23 = sbr.rel (!%p21_p10) target bundleno = 6 (0x6), region = 120 }
 0x291   :  { %884 = vsyncpa [#allocation3], 1 }
 0x292   :  { %886 = vsyncpa [#allocation3 + $0x1], 1 }
 0x293   :  { %887 = vsyncpa [#allocation5], 1 }
 0x294   :  { %889 = vsyncpa [#allocation5 + $0x1], 1 }

</bundles_post_ra>
